<compile_context>
chip_gen: v6e
topology: v6e:2x2x1
jax: 0.10.0
libtpu: 0.0.40
codegen_flags: <defaults>
</compile_context>

<pallas_src>
import functools

import jax
import jax.numpy as jnp
from jax.experimental import pallas as pl
from jax.experimental.pallas import tpu as pltpu


def _round_up(v, m):
    return ((v + m - 1) // m) * m


def _chamfer_kernel(x_ref, y_ref, d1_ref, d2p_ref, acc1_ref, *, precision):
    # x_ref:   (1, TN, 8)       augmented queries
    # y_ref:   (1, 8, TM)       augmented targets (pre-transposed)
    # d1_ref:  (1, TN, 1)       min over M for this N-tile (written at last M-tile)
    # d2p_ref: (1, 1, 8, TM)    per-(batch, N-tile) partial column mins (8 sublanes)
    # acc1_ref: VMEM (TN, 128)  running strip-min accumulator across M-tiles
    j = pl.program_id(2)
    tn = x_ref.shape[1]
    tm = y_ref.shape[2]

    @pl.when(j == 0)
    def _():
        acc1_ref[...] = jnp.full((tn, 128), jnp.inf, jnp.float32)

    x = x_ref[0]                                              # (TN, 8)
    yt = y_ref[0]                                             # (8, TM)
    # Augmented matmul: d[n, m] == |x_n - y_m|^2 (or ~1e30 for padded rows/cols).
    d = jnp.dot(x, yt, precision=precision,
                preferred_element_type=jnp.float32)           # (TN, TM)

    # d1: elementwise min over 128-lane strips (VPU); XLU lane-reduce deferred
    # to once per (batch, N-tile).  Static trip counts -> fully unrolled, and
    # all slices are (8,128)-tile aligned (no layout shuffles).
    m1 = acc1_ref[...]
    for s in range(tm // 128):
        m1 = jnp.minimum(m1, d[:, s * 128:(s + 1) * 128])
    acc1_ref[...] = m1

    # d2 partial: fold the TN rows into 8 sublanes with elementwise mins (VPU);
    # the final (n_tiles*8 -> 1) reduction happens outside the kernel.
    g = d[0:8, :]
    for k in range(1, tn // 8):
        g = jnp.minimum(g, d[k * 8:(k + 1) * 8, :])
    d2p_ref[0, 0] = g

    @pl.when(j == pl.num_programs(2) - 1)
    def _():
        d1_ref[0] = jnp.min(acc1_ref[...], axis=1, keepdims=True)


def _augment(pcs1, pcs2, n_pad, m_pad):
    """Build augmented operands so x_aug @ yt_aug gives squared distances."""
    B, N, _ = pcs1.shape
    _, M, _ = pcs2.shape
    x = pcs1.astype(jnp.float32)
    y = pcs2.astype(jnp.float32)

    # Shared per-batch centroid (translation invariant) -> smaller |x|^2, |y|^2,
    # less cancellation in the |x|^2 + |y|^2 - 2 x.y formulation.
    c = (jnp.sum(x, axis=1) + jnp.sum(y, axis=1)) / jnp.float32(N + M)
    x = x - c[:, None, :]
    y = y - c[:, None, :]

    xsq = jnp.sum(x * x, axis=-1)            # (B, N)
    ysq = jnp.sum(y * y, axis=-1)            # (B, M)

    big = 1e30  # padded rows/cols get distance ~big to every real point

    x_aug = jnp.zeros((B, n_pad, 8), jnp.float32)
    x_aug = x_aug.at[:, :N, 0:3].set(-2.0 * x)
    x_aug = x_aug.at[:, :N, 3].set(xsq)
    x_aug = x_aug.at[:, :N, 4].set(1.0)
    x_aug = x_aug.at[:, N:, 3].set(big)      # padded query rows

    yt_aug = jnp.zeros((B, 8, m_pad), jnp.float32)
    yt_aug = yt_aug.at[:, 0:3, :M].set(jnp.swapaxes(y, 1, 2))
    yt_aug = yt_aug.at[:, 3, :M].set(1.0)
    yt_aug = yt_aug.at[:, 4, :M].set(ysq)
    yt_aug = yt_aug.at[:, 4, M:].set(big)    # padded target columns
    return x_aug, yt_aug


def _build_call(B, n_pad, m_pad, tn, tm, precision):
    n_tiles = n_pad // tn
    m_tiles = m_pad // tm
    return pl.pallas_call(
        functools.partial(_chamfer_kernel, precision=precision),
        out_shape=(
            jax.ShapeDtypeStruct((B, n_pad, 1), jnp.float32),
            jax.ShapeDtypeStruct((B, n_tiles, 8, m_pad), jnp.float32),
        ),
        grid_spec=pltpu.PrefetchScalarGridSpec(
            num_scalar_prefetch=0,
            grid=(B, n_tiles, m_tiles),
            in_specs=[
                pl.BlockSpec((1, tn, 8), lambda b, i, j: (b, i, 0)),
                pl.BlockSpec((1, 8, tm), lambda b, i, j: (b, 0, j)),
            ],
            out_specs=[
                pl.BlockSpec((1, tn, 1), lambda b, i, j: (b, i, 0)),
                pl.BlockSpec((1, 1, 8, tm), lambda b, i, j: (b, i, 0, j)),
            ],
            scratch_shapes=[pltpu.VMEM((tn, 128), jnp.float32)],
        ),
        compiler_params=pltpu.CompilerParams(
            dimension_semantics=("parallel", "parallel", "arbitrary"),
            vmem_limit_bytes=32 * 1024 * 1024,
        ),
    )


# Preferred MXU contraction precision; demoted to default once if the current
# Mosaic lowering rejects Precision.HIGHEST.
_MXU_PRECISION = [jax.lax.Precision.HIGHEST]


def chamfer_min_dists(pcs1, pcs2, *, tn_max=512, tm_max=2048):
    """pcs1: (B, N, 3), pcs2: (B, M, 3) -> (dist1 (B, N), dist2 (B, M)) squared min dists."""
    B, N, D = pcs1.shape
    B2, M, D2 = pcs2.shape
    assert B2 == B and D == 3 and D2 == 3

    tn = min(tn_max, _round_up(N, 8))
    tm = min(tm_max, _round_up(M, 128))
    assert tn % 8 == 0 and tm % 128 == 0
    n_pad = _round_up(N, tn)
    m_pad = _round_up(M, tm)

    x_aug, yt_aug = _augment(pcs1, pcs2, n_pad, m_pad)

    try:
        call = _build_call(B, n_pad, m_pad, tn, tm, _MXU_PRECISION[0])
        d1_p, d2_p = call(x_aug, yt_aug)
    except Exception:
        # Precision.HIGHEST not accepted by this Mosaic lowering; use default.
        _MXU_PRECISION[0] = None
        call = _build_call(B, n_pad, m_pad, tn, tm, None)
        d1_p, d2_p = call(x_aug, yt_aug)

    # Clamp tiny negatives from fp cancellation; drop padded rows/columns.
    dist1 = jnp.maximum(d1_p[:, :N, 0], 0.0)
    dist2 = jnp.maximum(jnp.min(d2_p, axis=(1, 2))[:, :M], 0.0)
    return dist1, dist2


def chamfer_distance(pcs1, pcs2, **tile_kwargs):
    """Matches PyTorch ChamferDistance.forward:
       (mean(sqrt(dist1)) + mean(sqrt(dist2))) / 2, scalar float32."""
    dist1, dist2 = chamfer_min_dists(pcs1, pcs2, **tile_kwargs)
    d1 = jnp.mean(jnp.sqrt(dist1))
    d2 = jnp.mean(jnp.sqrt(dist2))
    return (d1 + d2) / 2.0


if __name__ == "__main__":
    key = jax.random.PRNGKey(0)
    k1, k2 = jax.random.split(key)
    B, N, M, D = 2, 100, 300, 3
    pcs1 = jax.random.normal(k1, (B, N, D), dtype=jnp.float32)
    pcs2 = jax.random.normal(k2, (B, M, D), dtype=jnp.float32)

    # Reference in plain JAX (exact (x-y)^2 formulation).
    diff = pcs1[:, :, None, :] - pcs2[:, None, :, :]
    sq = jnp.sum(diff * diff, axis=-1)
    ref = (jnp.mean(jnp.sqrt(jnp.min(sq, axis=2)))
           + jnp.mean(jnp.sqrt(jnp.min(sq, axis=1)))) / 2.0

    # Tolerance is set to cover the (unlikely) default-precision MXU fallback;
    # with Precision.HIGHEST the error is at f32 level (~1e-6).
    TOL = 5e-3

    # Config 1: default tile caps (single tile per batch, uneven N/M -> padding path).
    out = jax.block_until_ready(chamfer_distance(pcs1, pcs2))
    assert jnp.isfinite(out), out
    assert jnp.allclose(out, ref, atol=TOL, rtol=TOL), (out, ref)

    # Config 2: small tile caps -> multi-tile grid (exercises the M-axis running
    # min, the per-N-tile d2 partials, and edge padding on both axes).
    out2 = jax.block_until_ready(chamfer_distance(pcs1, pcs2, tn_max=32, tm_max=128))
    assert jnp.isfinite(out2), out2
    assert jnp.allclose(out2, ref, atol=TOL, rtol=TOL), (out2, ref)

    print("KERNEL_OK")
</pallas_src>

<mosaic_0001>
module attributes {stable_mosaic.version = 11 : i64} {
  func.func @_chamfer_kernel(%arg0: i32, %arg1: i32, %arg2: i32, %arg3: memref<1x104x8xf32, #tpu.memory_space<vmem>>, %arg4: memref<1x8x384xf32, #tpu.memory_space<vmem>>, %arg5: memref<1x104x1xf32, #tpu.memory_space<vmem>>, %arg6: memref<1x1x8x384xf32, #tpu.memory_space<vmem>>, %arg7: memref<104x128xf32, #tpu.memory_space<vmem>>) attributes {dimension_semantics = [#tpu.dimension_semantics<parallel>, #tpu.dimension_semantics<parallel>, #tpu.dimension_semantics<arbitrary>], iteration_bounds = array<i64: 2, 1, 1>, scalar_prefetch = 0 : i64, scratch_operands = 1 : i64, tpu.core_type = #tpu.core_type<tc>, window_params = [{transform_indices = @transform_0, window_bounds = array<i64: 1, 104, 8>}, {transform_indices = @transform_1, window_bounds = array<i64: 1, 8, 384>}, {transform_indices = @transform_2, window_bounds = array<i64: 1, 104, 1>}, {transform_indices = @transform_3, window_bounds = array<i64: 1, 1, 8, 384>}]} {
    %c0_i32 = arith.constant 0 : i32
    %0 = arith.cmpi eq, %arg2, %c0_i32 : i32
    %1 = arith.extui %0 : i1 to i32
    %c0_i32_0 = arith.constant 0 : i32
    %2 = arith.cmpi ne, %1, %c0_i32_0 : i32
    scf.if %2 {
      %cst_16 = arith.constant 0x7F800000 : f32
      %47 = vector.broadcast %cst_16 : f32 to vector<104x128xf32>
      %c0_17 = arith.constant 0 : index
      %c0_18 = arith.constant 0 : index
      %48 = vector.load %arg7[%c0_17, %c0_18] : memref<104x128xf32, #tpu.memory_space<vmem>>, vector<104x128xf32>
      tpu.vector_store %arg7[%c0_17, %c0_18], %47 {strides = array<i32>} : memref<104x128xf32, #tpu.memory_space<vmem>>, vector<104x128xf32>,
    } else {
    }
    %c0 = arith.constant 0 : index
    %c0_1 = arith.constant 0 : index
    %c0_2 = arith.constant 0 : index
    %3 = vector.load %arg3[%c0, %c0_1, %c0_2] : memref<1x104x8xf32, #tpu.memory_space<vmem>>, vector<1x104x8xf32>
    %4 = vector.shape_cast %3 : vector<1x104x8xf32> to vector<104x8xf32>
    %c0_3 = arith.constant 0 : index
    %c0_4 = arith.constant 0 : index
    %c0_5 = arith.constant 0 : index
    %5 = vector.load %arg4[%c0_3, %c0_4, %c0_5] : memref<1x8x384xf32, #tpu.memory_space<vmem>>, vector<1x8x384xf32>
    %6 = vector.shape_cast %5 : vector<1x8x384xf32> to vector<8x384xf32>
    %cst = arith.constant dense<0.000000e+00> : vector<104x384xf32>
    %7 = tpu.matmul %4, %6, %cst {dimension_numbers = #tpu.dot_dimension_numbers<[1], [0], [0], [1], [0, 0, 1, 1], [], []>, precision = #tpu.contract_precision<fp32>} : vector<104x8xf32>, vector<8x384xf32>, vector<104x384xf32> -> vector<104x384xf32>
    %c0_6 = arith.constant 0 : index
    %c0_7 = arith.constant 0 : index
    %8 = vector.load %arg7[%c0_6, %c0_7] : memref<104x128xf32, #tpu.memory_space<vmem>>, vector<104x128xf32>
    %9 = vector.extract_strided_slice %7 {offsets = [0, 0], sizes = [104, 128], strides = [1, 1]} : vector<104x384xf32> to vector<104x128xf32>
    %10 = arith.minimumf %8, %9 : vector<104x128xf32>
    %11 = vector.extract_strided_slice %7 {offsets = [0, 128], sizes = [104, 128], strides = [1, 1]} : vector<104x384xf32> to vector<104x128xf32>
    %12 = arith.minimumf %10, %11 : vector<104x128xf32>
    %13 = vector.extract_strided_slice %7 {offsets = [0, 256], sizes = [104, 128], strides = [1, 1]} : vector<104x384xf32> to vector<104x128xf32>
    %14 = arith.minimumf %12, %13 : vector<104x128xf32>
    %c0_8 = arith.constant 0 : index
    %c0_9 = arith.constant 0 : index
    %15 = vector.load %arg7[%c0_8, %c0_9] : memref<104x128xf32, #tpu.memory_space<vmem>>, vector<104x128xf32>
    tpu.vector_store %arg7[%c0_8, %c0_9], %14 {strides = array<i32>} : memref<104x128xf32, #tpu.memory_space<vmem>>, vector<104x128xf32>,
    %16 = vector.extract_strided_slice %7 {offsets = [0, 0], sizes = [8, 384], strides = [1, 1]} : vector<104x384xf32> to vector<8x384xf32>
    %17 = vector.extract_strided_slice %7 {offsets = [8, 0], sizes = [8, 384], strides = [1, 1]} : vector<104x384xf32> to vector<8x384xf32>
    %18 = arith.minimumf %16, %17 : vector<8x384xf32>
    %19 = vector.extract_strided_slice %7 {offsets = [16, 0], sizes = [8, 384], strides = [1, 1]} : vector<104x384xf32> to vector<8x384xf32>
    %20 = arith.minimumf %18, %19 : vector<8x384xf32>
    %21 = vector.extract_strided_slice %7 {offsets = [24, 0], sizes = [8, 384], strides = [1, 1]} : vector<104x384xf32> to vector<8x384xf32>
    %22 = arith.minimumf %20, %21 : vector<8x384xf32>
    %23 = vector.extract_strided_slice %7 {offsets = [32, 0], sizes = [8, 384], strides = [1, 1]} : vector<104x384xf32> to vector<8x384xf32>
    %24 = arith.minimumf %22, %23 : vector<8x384xf32>
    %25 = vector.extract_strided_slice %7 {offsets = [40, 0], sizes = [8, 384], strides = [1, 1]} : vector<104x384xf32> to vector<8x384xf32>
    %26 = arith.minimumf %24, %25 : vector<8x384xf32>
    %27 = vector.extract_strided_slice %7 {offsets = [48, 0], sizes = [8, 384], strides = [1, 1]} : vector<104x384xf32> to vector<8x384xf32>
    %28 = arith.minimumf %26, %27 : vector<8x384xf32>
    %29 = vector.extract_strided_slice %7 {offsets = [56, 0], sizes = [8, 384], strides = [1, 1]} : vector<104x384xf32> to vector<8x384xf32>
    %30 = arith.minimumf %28, %29 : vector<8x384xf32>
    %31 = vector.extract_strided_slice %7 {offsets = [64, 0], sizes = [8, 384], strides = [1, 1]} : vector<104x384xf32> to vector<8x384xf32>
    %32 = arith.minimumf %30, %31 : vector<8x384xf32>
    %33 = vector.extract_strided_slice %7 {offsets = [72, 0], sizes = [8, 384], strides = [1, 1]} : vector<104x384xf32> to vector<8x384xf32>
    %34 = arith.minimumf %32, %33 : vector<8x384xf32>
    %35 = vector.extract_strided_slice %7 {offsets = [80, 0], sizes = [8, 384], strides = [1, 1]} : vector<104x384xf32> to vector<8x384xf32>
    %36 = arith.minimumf %34, %35 : vector<8x384xf32>
    %37 = vector.extract_strided_slice %7 {offsets = [88, 0], sizes = [8, 384], strides = [1, 1]} : vector<104x384xf32> to vector<8x384xf32>
    %38 = arith.minimumf %36, %37 : vector<8x384xf32>
    %39 = vector.extract_strided_slice %7 {offsets = [96, 0], sizes = [8, 384], strides = [1, 1]} : vector<104x384xf32> to vector<8x384xf32>
    %40 = arith.minimumf %38, %39 : vector<8x384xf32>
    %c0_10 = arith.constant 0 : index
    %c0_11 = arith.constant 0 : index
    %c0_12 = arith.constant 0 : index
    %c0_13 = arith.constant 0 : index
    %41 = vector.load %arg6[%c0_10, %c0_11, %c0_12, %c0_13] : memref<1x1x8x384xf32, #tpu.memory_space<vmem>>, vector<1x1x8x384xf32>
    %42 = vector.shape_cast %41 : vector<1x1x8x384xf32> to vector<8x384xf32>
    %43 = vector.shape_cast %40 : vector<8x384xf32> to vector<1x1x8x384xf32>
    tpu.vector_store %arg6[%c0_10, %c0_11, %c0_12, %c0_13], %43 {strides = array<i32>} : memref<1x1x8x384xf32, #tpu.memory_space<vmem>>, vector<1x1x8x384xf32>,
    %c0_i32_14 = arith.constant 0 : i32
    %44 = arith.cmpi eq, %arg2, %c0_i32_14 : i32
    %45 = arith.extui %44 : i1 to i32
    %c0_i32_15 = arith.constant 0 : i32
    %46 = arith.cmpi ne, %45, %c0_i32_15 : i32
    scf.if %46 {
      %c0_16 = arith.constant 0 : index
      %c0_17 = arith.constant 0 : index
      %47 = vector.load %arg7[%c0_16, %c0_17] : memref<104x128xf32, #tpu.memory_space<vmem>>, vector<104x128xf32>
      %cst_18 = arith.constant dense<0x7F800000> : vector<104xf32>
      %48 = vector.multi_reduction <minimumf>, %47, %cst_18 [1] : vector<104x128xf32> to vector<104xf32>
      %49 = vector.shape_cast %48 : vector<104xf32> to vector<104x1xf32>
      %c0_19 = arith.constant 0 : index
      %c0_20 = arith.constant 0 : index
      %c0_21 = arith.constant 0 : index
      %50 = vector.load %arg5[%c0_19, %c0_20, %c0_21] : memref<1x104x1xf32, #tpu.memory_space<vmem>>, vector<1x104x1xf32>
      %51 = vector.shape_cast %50 : vector<1x104x1xf32> to vector<104x1xf32>
      %52 = vector.shape_cast %49 : vector<104x1xf32> to vector<1x104x1xf32>
      tpu.vector_store %arg5[%c0_19, %c0_20, %c0_21], %52 {strides = array<i32>} : memref<1x104x1xf32, #tpu.memory_space<vmem>>, vector<1x104x1xf32>,
    } else {
    }
    return
  }
  func.func @transform_0(%arg0: i32, %arg1: i32, %arg2: i32) -> (i32, i32, i32) {
    %c0_i32 = arith.constant 0 : i32
    %c0_i32_0 = arith.constant 0 : i32
    return %arg0, %arg1, %c0_i32 : i32, i32, i32
  }
  func.func @transform_1(%arg0: i32, %arg1: i32, %arg2: i32) -> (i32, i32, i32) {
    %c0_i32 = arith.constant 0 : i32
    %c0_i32_0 = arith.constant 0 : i32
    return %arg0, %c0_i32, %arg2 : i32, i32, i32
  }
  func.func @transform_2(%arg0: i32, %arg1: i32, %arg2: i32) -> (i32, i32, i32) {
    %c0_i32 = arith.constant 0 : i32
    %c0_i32_0 = arith.constant 0 : i32
    return %arg0, %arg1, %c0_i32 : i32, i32, i32
  }
  func.func @transform_3(%arg0: i32, %arg1: i32, %arg2: i32) -> (i32, i32, i32, i32) {
    %c0_i32 = arith.constant 0 : i32
    %c0_i32_0 = arith.constant 0 : i32
    return %arg0, %arg1, %c0_i32, %arg2 : i32, i32, i32, i32
  }
}

module attributes {stable_mosaic.version = 11 : i64} {
  func.func @_chamfer_kernel(%arg0: i32, %arg1: i32, %arg2: i32, %arg3: memref<1x104x8xf32, #tpu.memory_space<vmem>>, %arg4: memref<1x8x384xf32, #tpu.memory_space<vmem>>, %arg5: memref<1x104x1xf32, #tpu.memory_space<vmem>>, %arg6: memref<1x1x8x384xf32, #tpu.memory_space<vmem>>, %arg7: memref<104x128xf32, #tpu.memory_space<vmem>>) attributes {dimension_semantics = [#tpu.dimension_semantics<parallel>, #tpu.dimension_semantics<parallel>, #tpu.dimension_semantics<arbitrary>], iteration_bounds = array<i64: 2, 1, 1>, scalar_prefetch = 0 : i64, scratch_operands = 1 : i64, tpu.core_type = #tpu.core_type<tc>, window_params = [{transform_indices = @transform_0, window_bounds = array<i64: 1, 104, 8>}, {transform_indices = @transform_1, window_bounds = array<i64: 1, 8, 384>}, {transform_indices = @transform_2, window_bounds = array<i64: 1, 104, 1>}, {transform_indices = @transform_3, window_bounds = array<i64: 1, 1, 8, 384>}]} {
    %c0_i32 = arith.constant 0 : i32
    %0 = arith.cmpi eq, %arg2, %c0_i32 : i32
    %1 = arith.extui %0 : i1 to i32
    %c0_i32_0 = arith.constant 0 : i32
    %2 = arith.cmpi ne, %1, %c0_i32_0 : i32
    scf.if %2 {
      %cst_16 = arith.constant 0x7F800000 : f32
      %47 = vector.broadcast %cst_16 : f32 to vector<104x128xf32>
      %c0_17 = arith.constant 0 : index
      %c0_18 = arith.constant 0 : index
      %48 = vector.load %arg7[%c0_17, %c0_18] : memref<104x128xf32, #tpu.memory_space<vmem>>, vector<104x128xf32>
      tpu.vector_store %arg7[%c0_17, %c0_18], %47 {strides = array<i32>} : memref<104x128xf32, #tpu.memory_space<vmem>>, vector<104x128xf32>,
    } else {
    }
    %c0 = arith.constant 0 : index
    %c0_1 = arith.constant 0 : index
    %c0_2 = arith.constant 0 : index
    %3 = vector.load %arg3[%c0, %c0_1, %c0_2] : memref<1x104x8xf32, #tpu.memory_space<vmem>>, vector<1x104x8xf32>
    %4 = vector.shape_cast %3 : vector<1x104x8xf32> to vector<104x8xf32>
    %c0_3 = arith.constant 0 : index
    %c0_4 = arith.constant 0 : index
    %c0_5 = arith.constant 0 : index
    %5 = vector.load %arg4[%c0_3, %c0_4, %c0_5] : memref<1x8x384xf32, #tpu.memory_space<vmem>>, vector<1x8x384xf32>
    %6 = vector.shape_cast %5 : vector<1x8x384xf32> to vector<8x384xf32>
    %cst = arith.constant dense<0.000000e+00> : vector<104x384xf32>
    %7 = tpu.matmul %4, %6, %cst {dimension_numbers = #tpu.dot_dimension_numbers<[1], [0], [0], [1], [0, 0, 1, 1], [], []>} : vector<104x8xf32>, vector<8x384xf32>, vector<104x384xf32> -> vector<104x384xf32>
    %c0_6 = arith.constant 0 : index
    %c0_7 = arith.constant 0 : index
    %8 = vector.load %arg7[%c0_6, %c0_7] : memref<104x128xf32, #tpu.memory_space<vmem>>, vector<104x128xf32>
    %9 = vector.extract_strided_slice %7 {offsets = [0, 0], sizes = [104, 128], strides = [1, 1]} : vector<104x384xf32> to vector<104x128xf32>
    %10 = arith.minimumf %8, %9 : vector<104x128xf32>
    %11 = vector.extract_strided_slice %7 {offsets = [0, 128], sizes = [104, 128], strides = [1, 1]} : vector<104x384xf32> to vector<104x128xf32>
    %12 = arith.minimumf %10, %11 : vector<104x128xf32>
    %13 = vector.extract_strided_slice %7 {offsets = [0, 256], sizes = [104, 128], strides = [1, 1]} : vector<104x384xf32> to vector<104x128xf32>
    %14 = arith.minimumf %12, %13 : vector<104x128xf32>
    %c0_8 = arith.constant 0 : index
    %c0_9 = arith.constant 0 : index
    %15 = vector.load %arg7[%c0_8, %c0_9] : memref<104x128xf32, #tpu.memory_space<vmem>>, vector<104x128xf32>
    tpu.vector_store %arg7[%c0_8, %c0_9], %14 {strides = array<i32>} : memref<104x128xf32, #tpu.memory_space<vmem>>, vector<104x128xf32>,
    %16 = vector.extract_strided_slice %7 {offsets = [0, 0], sizes = [8, 384], strides = [1, 1]} : vector<104x384xf32> to vector<8x384xf32>
    %17 = vector.extract_strided_slice %7 {offsets = [8, 0], sizes = [8, 384], strides = [1, 1]} : vector<104x384xf32> to vector<8x384xf32>
    %18 = arith.minimumf %16, %17 : vector<8x384xf32>
    %19 = vector.extract_strided_slice %7 {offsets = [16, 0], sizes = [8, 384], strides = [1, 1]} : vector<104x384xf32> to vector<8x384xf32>
    %20 = arith.minimumf %18, %19 : vector<8x384xf32>
    %21 = vector.extract_strided_slice %7 {offsets = [24, 0], sizes = [8, 384], strides = [1, 1]} : vector<104x384xf32> to vector<8x384xf32>
    %22 = arith.minimumf %20, %21 : vector<8x384xf32>
    %23 = vector.extract_strided_slice %7 {offsets = [32, 0], sizes = [8, 384], strides = [1, 1]} : vector<104x384xf32> to vector<8x384xf32>
    %24 = arith.minimumf %22, %23 : vector<8x384xf32>
    %25 = vector.extract_strided_slice %7 {offsets = [40, 0], sizes = [8, 384], strides = [1, 1]} : vector<104x384xf32> to vector<8x384xf32>
    %26 = arith.minimumf %24, %25 : vector<8x384xf32>
    %27 = vector.extract_strided_slice %7 {offsets = [48, 0], sizes = [8, 384], strides = [1, 1]} : vector<104x384xf32> to vector<8x384xf32>
    %28 = arith.minimumf %26, %27 : vector<8x384xf32>
    %29 = vector.extract_strided_slice %7 {offsets = [56, 0], sizes = [8, 384], strides = [1, 1]} : vector<104x384xf32> to vector<8x384xf32>
    %30 = arith.minimumf %28, %29 : vector<8x384xf32>
    %31 = vector.extract_strided_slice %7 {offsets = [64, 0], sizes = [8, 384], strides = [1, 1]} : vector<104x384xf32> to vector<8x384xf32>
    %32 = arith.minimumf %30, %31 : vector<8x384xf32>
    %33 = vector.extract_strided_slice %7 {offsets = [72, 0], sizes = [8, 384], strides = [1, 1]} : vector<104x384xf32> to vector<8x384xf32>
    %34 = arith.minimumf %32, %33 : vector<8x384xf32>
    %35 = vector.extract_strided_slice %7 {offsets = [80, 0], sizes = [8, 384], strides = [1, 1]} : vector<104x384xf32> to vector<8x384xf32>
    %36 = arith.minimumf %34, %35 : vector<8x384xf32>
    %37 = vector.extract_strided_slice %7 {offsets = [88, 0], sizes = [8, 384], strides = [1, 1]} : vector<104x384xf32> to vector<8x384xf32>
    %38 = arith.minimumf %36, %37 : vector<8x384xf32>
    %39 = vector.extract_strided_slice %7 {offsets = [96, 0], sizes = [8, 384], strides = [1, 1]} : vector<104x384xf32> to vector<8x384xf32>
    %40 = arith.minimumf %38, %39 : vector<8x384xf32>
    %c0_10 = arith.constant 0 : index
    %c0_11 = arith.constant 0 : index
    %c0_12 = arith.constant 0 : index
    %c0_13 = arith.constant 0 : index
    %41 = vector.load %arg6[%c0_10, %c0_11, %c0_12, %c0_13] : memref<1x1x8x384xf32, #tpu.memory_space<vmem>>, vector<1x1x8x384xf32>
    %42 = vector.shape_cast %41 : vector<1x1x8x384xf32> to vector<8x384xf32>
    %43 = vector.shape_cast %40 : vector<8x384xf32> to vector<1x1x8x384xf32>
    tpu.vector_store %arg6[%c0_10, %c0_11, %c0_12, %c0_13], %43 {strides = array<i32>} : memref<1x1x8x384xf32, #tpu.memory_space<vmem>>, vector<1x1x8x384xf32>,
    %c0_i32_14 = arith.constant 0 : i32
    %44 = arith.cmpi eq, %arg2, %c0_i32_14 : i32
    %45 = arith.extui %44 : i1 to i32
    %c0_i32_15 = arith.constant 0 : i32
    %46 = arith.cmpi ne, %45, %c0_i32_15 : i32
    scf.if %46 {
      %c0_16 = arith.constant 0 : index
      %c0_17 = arith.constant 0 : index
      %47 = vector.load %arg7[%c0_16, %c0_17] : memref<104x128xf32, #tpu.memory_space<vmem>>, vector<104x128xf32>
      %cst_18 = arith.constant dense<0x7F800000> : vector<104xf32>
      %48 = vector.multi_reduction <minimumf>, %47, %cst_18 [1] : vector<104x128xf32> to vector<104xf32>
      %49 = vector.shape_cast %48 : vector<104xf32> to vector<104x1xf32>
      %c0_19 = arith.constant 0 : index
      %c0_20 = arith.constant 0 : index
      %c0_21 = arith.constant 0 : index
      %50 = vector.load %arg5[%c0_19, %c0_20, %c0_21] : memref<1x104x1xf32, #tpu.memory_space<vmem>>, vector<1x104x1xf32>
      %51 = vector.shape_cast %50 : vector<1x104x1xf32> to vector<104x1xf32>
      %52 = vector.shape_cast %49 : vector<104x1xf32> to vector<1x104x1xf32>
      tpu.vector_store %arg5[%c0_19, %c0_20, %c0_21], %52 {strides = array<i32>} : memref<1x104x1xf32, #tpu.memory_space<vmem>>, vector<1x104x1xf32>,
    } else {
    }
    return
  }
  func.func @transform_0(%arg0: i32, %arg1: i32, %arg2: i32) -> (i32, i32, i32) {
    %c0_i32 = arith.constant 0 : i32
    %c0_i32_0 = arith.constant 0 : i32
    return %arg0, %arg1, %c0_i32 : i32, i32, i32
  }
  func.func @transform_1(%arg0: i32, %arg1: i32, %arg2: i32) -> (i32, i32, i32) {
    %c0_i32 = arith.constant 0 : i32
    %c0_i32_0 = arith.constant 0 : i32
    return %arg0, %c0_i32, %arg2 : i32, i32, i32
  }
  func.func @transform_2(%arg0: i32, %arg1: i32, %arg2: i32) -> (i32, i32, i32) {
    %c0_i32 = arith.constant 0 : i32
    %c0_i32_0 = arith.constant 0 : i32
    return %arg0, %arg1, %c0_i32 : i32, i32, i32
  }
  func.func @transform_3(%arg0: i32, %arg1: i32, %arg2: i32) -> (i32, i32, i32, i32) {
    %c0_i32 = arith.constant 0 : i32
    %c0_i32_0 = arith.constant 0 : i32
    return %arg0, %arg1, %c0_i32, %arg2 : i32, i32, i32, i32
  }
}

</mosaic_0001>

<bundles_post_ra>
// kernel: tpu_custom_call.1
= control target key start
LH: loop header
LB: loop body
LE: loop exit
PB: predicated region body
PF: predicated region fallthrough
CT: control target
= control target key end

     0   :  { %9 = vsyncpa [#allocation4], 0  ;;  %s4382_s0 = inlined_call_operand.vmem [shape: f32[2,104,8], index: 0, kind: input, shape index: {}]   ;;  %s4383_s1 = inlined_call_operand.vmem [shape: f32[2,8,384], index: 1, kind: input, shape index: {}]   ;;  %s4384_s2 = inlined_call_operand.vmem [shape: f32[2,104,1], index: 2, kind: output, shape index: {0}]   ;;  %s4385_s3 = inlined_call_operand.hbm [shape: f32[2,1,8,384], index: 3, kind: output, shape index: {1}]  }
   0x1   :  { %11 = vsyncpa [#allocation4 + $0x1], 0  ;;  %s3188_s12 = smov 0   ;;  %s3190_s13 = smov 0  }
   0x2   :  { %s3192_s14 = smov 0   ;;  %s3194_s15 = smov 0  }
   0x3   :  { %s3196_s16 = smov 0   ;;  %s3198_s17 = smov 0  }
   0x4 LB: > { %s2685_s18 = sadd.s32 4294967295, %s3163_s17   ;;  %s2686_s19 = sadd.s32 4294967294, %s3163_s17   ;;  %s3163_s17 = sphi %s3198_s17, %s17_s17   ;;  %s3159_s16 = sphi %s3196_s16, %s4463_s16   ;;  %s3155_s15 = sphi %s3194_s15, %s4462_s15   ;;  %s3151_s14 = sphi %s3192_s14, %s4461_s14   ;;  %s3147_s13 = sphi %s3190_s13, %s4460_s13   ;;  %s3143_s12 = sphi %s3188_s12, %s4459_s12  }
   0x5   : > { %s36_s20 = sadd.s32 1, %s3159_s16  ;;  %s131_s21 = sadd.s32 1, %s3151_s14 }
   0x6   : > { %p38_p0 = scmp.ge.s32.totalorder %s36_s20, 2  ;;  %p141_p1 = scmp.ne.s32.totalorder %s3151_s14, %s3147_s13 }
   0x7   : > { %p142_p2 = scmp.eq.s32.totalorder %s2685_s18, 1  ;;  %p147_p3 = scmp.ne.s32.totalorder %s3147_s13, %s3143_s12 }
   0x8   : > { %s4465_s20 = smov (%p38_p0, %s36_s20), 0  ;;  %p148_p5 = scmp.eq.s32.totalorder %s2686_s19, 1 }
   0x9   : > { %p3228_p4 = por %p142_p2, %p141_p1  ;;  %s124_s23 = ssub.s32 %s3159_s16, %s4465_s20 }
   0xa   : > { %p2689_p6 = scmp.ge.s32.totalorder %s3163_s17, 1  ;;  %p129_p7 = scmp.eq.s32.totalorder %s124_s23, 0 }
   0xb   : > { %p3235_p8 = por %p148_p5, %p147_p3  ;;  %p192_p9 = scmp.lt.s32.totalorder %s3163_s17, 3 }
   0xc   : > { %s3241_s25 = scalar_select %p129_p7, %s3151_s14, %s131_s21  }
   0xd   : > { %p193_p10 = pnand %p2689_p6, %p192_p9 }
   0xf   : > { %196 = sbr.rel (%p193_p10) target bundleno = 685 (0x2ad), region = 28 }
  0x14   : > { %p239_p11 = scmp.lt.s32.totalorder %s3155_s15, 1  ;;  %v3165_v0 = vmov 0.0   ;;  %vm302_vm0 = vcmask 64512   ;;  %vm3166_vm1 = vmmov 0   ;;  %s235_s8 = sand.u32 1, %s3147_s13  }
  0x15   : > { %408 = vmatprep.mubr.f32.mxu0 %v3165_v0  ;;  %626 = vmatprep.mubr.f32.mxu1 %v3165_v0  ;;  %s3026_s9 = smul.u32 24, %s235_s8  ;;  %s3167_s30 = smov [#allocation3]  }
  0x16   : > { %s3247_s26 = scalar_select %p239_p11, %s3155_s15, 1 }
  0x17   : > { %s4180_s10 = scalar_lea.vmem [#allocation3], %s3026_s9  ;;  %s3029_s11 = smul.u32 384, %s3155_s15 }
  0x18   : > { %s3027_s27 = smul.u32 104, %s3247_s26  ;;  %s2549_s18 = sshll.u32 %s4180_s10, 4  ;;  %s2550_s18 = int_to_ptr.vmem [resolvable:$true] %s2549_s18 }
  0x19   : > { %s3028_s28 = smul.u32 24, %s3247_s26  ;;  %s2547_s23 = scalar_lea.hbm %s4385_s3, %s3029_s11 }
  0x1a   : > { %s3256_s4 = scalar_lea.vmem %s4382_s0, %s3027_s27  ;;  %s3087_s29 = scalar_lea.vmem %s2550_s18, 384 }
  0x1b   : > { %s3261_s7 = scalar_lea.vmem %s4383_s1, %s3028_s28  ;;  %v286_v1 = vld [vmem:[%s3256_s4] sm:$0xff]  ;;  %v287_v2 = vld [vmem:[%s3256_s4 + $0x8] sm:$0xff]  ;;  %v288_v3 = vld [vmem:[%s3256_s4 + $0x10] sm:$0xff]  ;;  %s2527_s28 = scalar_lea.sflag [#allocation4], %s235_s8 }
  0x1c   : > { %v300_v4 = vld [vmem:[%s3261_s7 + $0x8] sm:$0xff]  ;;  %v299_v5 = vld [vmem:[%s3261_s7] sm:$0xff]  ;;  %v304_v6 = vsel %vm302_vm0, %v286_v1, 0  ;;  %v307_v7 = vsel %vm302_vm0, %v287_v2, 0  ;;  %v310_v8 = vsel %vm302_vm0, %v288_v3, 0  ;;  %v289_v9 = vld [vmem:[%s3256_s4 + $0x18] sm:$0xff]  ;;  %p3088_p12 = scmp.ne.s32.totalorder %s2550_s18, %s3087_s29 }
  0x1d   : > { %v372_v10 = vand.u32 4294901760, %v300_v4  ;;  %v3272_v11 = vand.u32 4294901760, %v299_v5  ;;  %v3274_v12 = vand.u32 4294901760, %v304_v6  ;;  %v3276_v13 = vand.u32 4294901760, %v307_v7  ;;  %v290_v14 = vld [vmem:[%s3256_s4 + $0x20] sm:$0xff]  ;;  %v291_v22 = vld [vmem:[%s3256_s4 + $0x28] sm:$0xff] }
  0x1e   : > { %v3279_v15 = vand.u32 4294901760, %v310_v8  ;;  %v313_v16 = vsel %vm302_vm0, %v289_v9, 0  ;;  %v316_v17 = vsel %vm302_vm0, %v290_v14, 0  ;;  %v319_v32 = vsel %vm302_vm0, %v291_v22, 0  ;;  %v292_v40 = vld [vmem:[%s3256_s4 + $0x30] sm:$0xff]  ;;  %v293_v47 = vld [vmem:[%s3256_s4 + $0x38] sm:$0xff]  ;;  %p3089_p13 = pnand %p3088_p12, %p3228_p4 }
  0x1f   : > { %373 = vmatprep.subr.mxu0 %v372_v10  ;;  %v583_v18 = vsub.f32 %v300_v4, %v372_v10  ;;  %v3284_v19 = vsub.f32 %v304_v6, %v3274_v12  ;;  %v3287_v20 = vsub.f32 %v299_v5, %v3272_v11  ;;  %v3290_v21 = vsub.f32 %v307_v7, %v3276_v13  ;;  %v294_v54 = vld [vmem:[%s3256_s4 + $0x40] sm:$0xff]  ;;  %v295_v60 = vld [vmem:[%s3256_s4 + $0x48] sm:$0xff]  ;;  %v296_v5 = vld [vmem:[%s3256_s4 + $0x50] sm:$0xff] }
  0x20   : > { %375 = vmatpush1.msra.mxu0 %v3272_v11  ;;  %v3295_v23 = vsub.f32 %v310_v8, %v3279_v15  ;;  %v3297_v24 = vand.u32 4294901760, %v313_v16  ;;  %v3312_v31 = vand.u32 4294901760, %v316_v17  ;;  %v3325_v41 = vand.u32 4294901760, %v319_v32  ;;  %p3090_p0 = pneg %p3089_p13 }
  0x21   : > { %v584_v25 = vand.u32 4294901760, %v583_v18  ;;  %750 = vmatprep.subr.mxu0 %v583_v18  ;;  %v3300_v26 = vand.u32 4294901760, %v3284_v19  ;;  %v590_v27 = vand.u32 4294901760, %v3287_v20  ;;  %v3304_v28 = vand.u32 4294901760, %v3290_v21 }
  0x22   : > { %v3307_v29 = vand.u32 4294901760, %v3295_v23  ;;  %v3310_v30 = vsub.f32 %v313_v16, %v3297_v24  ;;  %v3336_v45 = vsub.f32 %v316_v17, %v3312_v31  ;;  %v322_v46 = vsel %vm302_vm0, %v292_v40, 0  ;;  %v297_v16 = vld [vmem:[%s3256_s4 + $0x58] sm:$0xff] }
  0x23   : > { %v585_v33 = vsub.f32 %v583_v18, %v584_v25  ;;  %v412_v34 = vsub.f32 %v3284_v19, %v3300_v26  ;;  %v591_v35 = vsub.f32 %v3287_v20, %v590_v27  ;;  %v423_v36 = vsub.f32 %v3290_v21, %v3304_v28 }
  0x24   : > { %v434_v43 = vsub.f32 %v3295_v23, %v3307_v29  ;;  %v3333_v44 = vand.u32 4294901760, %v3310_v30  ;;  %v3345_v48 = vsub.f32 %v319_v32, %v3325_v41  ;;  %v3354_v51 = vand.u32 4294901760, %v3336_v45 }
  0x25   : > { %v586_v37 = vand.u32 4294901760, %v585_v33  ;;  %v3322_v38 = vand.u32 4294901760, %v412_v34  ;;  %v592_v39 = vand.u32 4294901760, %v591_v35  ;;  %v3328_v42 = vand.u32 4294901760, %v423_v36  ;;  %v298_v34 = vld [vmem:[%s3256_s4 + $0x60] sm:$0xff]  ;;  %s3091_s4 = sshll.u32 %s3167_s30, 4  ;;  %s3092_s4 = int_to_ptr.vmem [resolvable:$false] %s3091_s4 }
  0x26   : > { %v3349_v49 = vand.u32 4294901760, %v434_v43  ;;  %v445_v50 = vsub.f32 %v3310_v30, %v3333_v44  ;;  %v3356_v52 = vand.u32 4294901760, %v322_v46  ;;  %v325_v53 = vsel %vm302_vm0, %v293_v47, 0  ;;  %s3093_s5 = scalar_lea.vmem %s3092_s4, 768  ;;  %p3094_p1 = scmp.lt.s32.totalorder %s2550_s18, %s3092_s4 }
  0x27   : > { %587 = vmatprep.subr.mxu1 %v586_v37  ;;  %414 = vmatmul.mubr.f32.vlgmr.msra.gmra.mxu0 %v3322_v38  ;;  %v3364_v55 = vand.u32 4294901760, %v3345_v48  ;;  %v456_v57 = vsub.f32 %v3336_v45, %v3354_v51  ;;  %v3374_v59 = vand.u32 4294901760, %v325_v53  ;;  %v328_v61 = vsel %vm302_vm0, %v294_v54, 0  ;;  %p3095_p2 = scmp.lt.s32.totalorder %s3093_s5, %s3087_s29 }
  0x28   : > { %593 = vmatpush1.msra.mxu1 %v592_v39  ;;  %753 = vmatpush1.msra.mxu0 %v3287_v20  ;;  %v3367_v56 = vand.u32 4294901760, %v445_v50  ;;  %v3372_v58 = vsub.f32 %v322_v46, %v3356_v52  ;;  %v331_v63 = vsel %vm302_vm0, %v295_v60, 0  ;;  %v3393_v4 = vand.u32 4294901760, %v328_v61 }
  0x29   : > { %628 = vmatmul.mubr.f32.vlgmr.msra.gmra.mxu1 %v3274_v12  ;;  %922 = vmatprep.subr.mxu1 %v372_v10  ;;  %v467_v62 = vsub.f32 %v3345_v48, %v3364_v55  ;;  %v3385_v1 = vand.u32 4294901760, %v456_v57  ;;  %v3391_v3 = vsub.f32 %v325_v53, %v3374_v59  ;;  %v3401_v7 = vand.u32 4294901760, %v331_v63  ;;  %p3096_p3 = por %p3095_p2, %p3094_p1 }
  0x2a   : > { %924 = vmatpush1.msra.mxu1 %v3272_v11  ;;  %419 = vmatprep.mubr.f32.mxu0 %v3165_v0  ;;  %v3388_v2 = vand.u32 4294901760, %v3372_v58  ;;  %v334_v14 = vsel %vm302_vm0, %v296_v5, 0  ;;  %v337_v18 = vsel %vm302_vm0, %v297_v16, 0  ;;  %v340_v36 = vsel %vm302_vm0, %v298_v34, 0 }
  0x2b   : > { %425 = vmatmul.mubr.f32.gmra.mxu0 %v3328_v42  ;;  %633 = vmatprep.mubr.f32.mxu1 %v3165_v0  ;;  %v3399_v6 = vand.u32 4294901760, %v467_v62  ;;  %v3407_v9 = vand.u32 4294901760, %v3391_v3  ;;  %v3417_v17 = vand.u32 4294901760, %v334_v14  ;;  %v3429_v33 = vsub.f32 %v331_v63, %v3401_v7  ;;  %p3097_p5 = pnand %p3096_p3, %p3090_p0 }
  0x2c   : > { %430 = vmatprep.mubr.f32.mxu0 %v3165_v0  ;;  %1108 = vmatprep.subr.mxu0 %v584_v25  ;;  %v478_v8 = vsub.f32 %v3372_v58, %v3388_v2  ;;  %v3435_v35 = vand.u32 4294901760, %v337_v18  ;;  %v3452_v46 = vand.u32 4294901760, %v340_v36 }
  0x2d   : > { %635 = vmatmul.mubr.f32.gmra.mxu1 %v3276_v13  ;;  %1268 = vmatprep.subr.mxu1 %v372_v10  ;;  %v3410_v10 = vsub.f32 %v328_v61, %v3393_v4  ;;  %v489_v25 = vsub.f32 %v3391_v3, %v3407_v9  ;;  %v3444_v40 = vand.u32 4294901760, %v3429_v33  ;;  %v3447_v43 = vsub.f32 %v334_v14, %v3417_v17 }
  0x2e   : > { %640 = vmatprep.mubr.f32.mxu1 %v3165_v0  ;;  %v3421_v22 = vand.u32 4294901760, %v478_v8  ;;  %v3463_v54 = vsub.f32 %v337_v18, %v3435_v35  ;;  %v3477_v62 = vsub.f32 %v340_v36, %v3452_v46 }
  0x2f   : > { %436 = vmatmul.mubr.f32.gmra.mxu0 %v3349_v49  ;;  %v3426_v32 = vand.u32 4294901760, %v3410_v10  ;;  %v3439_v37 = vand.u32 4294901760, %v489_v25  ;;  %v511_v50 = vsub.f32 %v3429_v33, %v3444_v40  ;;  %v3460_v53 = vand.u32 4294901760, %v3447_v43 }
  0x30   : > { %441 = vmatprep.mubr.f32.mxu0 %v3165_v0  ;;  %v3474_v61 = vand.u32 4294901760, %v3463_v54  ;;  %v3488_v8 = vand.u32 4294901760, %v3477_v62 }
  0x31   : > { %642 = vmatmul.mubr.f32.gmra.mxu1 %v3279_v15  ;;  %v500_v39 = vsub.f32 %v3410_v10, %v3426_v32  ;;  %v3469_v57 = vand.u32 4294901760, %v511_v50  ;;  %v522_v60 = vsub.f32 %v3447_v43, %v3460_v53 }
  0x32   : > { %647 = vmatprep.mubr.f32.mxu1 %v3165_v0  ;;  %v533_v5 = vsub.f32 %v3463_v54, %v3474_v61  ;;  %v544_v16 = vsub.f32 %v3477_v62, %v3488_v8 }
  0x33   : > { %447 = vmatmul.mubr.f32.gmra.mxu0 %v3367_v56  ;;  %v3455_v47 = vand.u32 4294901760, %v500_v39  ;;  %v3483_v63 = vand.u32 4294901760, %v522_v60 }
  0x34   : > { %452 = vmatprep.mubr.f32.mxu0 %v3165_v0  ;;  %v3494_v14 = vand.u32 4294901760, %v533_v5  ;;  %v3502_v18 = vand.u32 4294901760, %v544_v16 }
  0x35   : > { %649 = vmatmul.mubr.f32.gmra.mxu1 %v3297_v24 }
  0x36   : > { %654 = vmatprep.mubr.f32.mxu1 %v3165_v0 }
  0x37   : > { %458 = vmatmul.mubr.f32.gmra.mxu0 %v3385_v1 }
  0x38   : > { %463 = vmatprep.mubr.f32.mxu0 %v3165_v0 }
  0x39   : > { %656 = vmatmul.mubr.f32.gmra.mxu1 %v3312_v31 }
  0x3a   : > { %661 = vmatprep.mubr.f32.mxu1 %v3165_v0 }
  0x3b   : > { %469 = vmatmul.mubr.f32.gmra.mxu0 %v3399_v6 }
  0x3c   : > { %474 = vmatprep.mubr.f32.mxu0 %v3165_v0 }
  0x3d   : > { %663 = vmatmul.mubr.f32.gmra.mxu1 %v3325_v41 }
  0x3e   : > { %668 = vmatprep.mubr.f32.mxu1 %v3165_v0 }
  0x3f   : > { %480 = vmatmul.mubr.f32.gmra.mxu0 %v3421_v22 }
  0x40   : > { %485 = vmatprep.mubr.f32.mxu0 %v3165_v0 }
  0x41   : > { %670 = vmatmul.mubr.f32.gmra.mxu1 %v3356_v52 }
  0x42   : > { %675 = vmatprep.mubr.f32.mxu1 %v3165_v0 }
  0x43   : > { %491 = vmatmul.mubr.f32.gmra.mxu0 %v3439_v37 }
  0x44   : > { %496 = vmatprep.mubr.f32.mxu0 %v3165_v0 }
  0x45   : > { %677 = vmatmul.mubr.f32.gmra.mxu1 %v3374_v59 }
  0x46   : > { %682 = vmatprep.mubr.f32.mxu1 %v3165_v0 }
  0x47   : > { %502 = vmatmul.mubr.f32.gmra.mxu0 %v3455_v47 }
  0x48   : > { %507 = vmatprep.mubr.f32.mxu0 %v3165_v0 }
  0x49   : > { %684 = vmatmul.mubr.f32.gmra.mxu1 %v3393_v4 }
  0x4a   : > { %689 = vmatprep.mubr.f32.mxu1 %v3165_v0 }
  0x4b   : > { %513 = vmatmul.mubr.f32.gmra.mxu0 %v3469_v57 }
  0x4c   : > { %518 = vmatprep.mubr.f32.mxu0 %v3165_v0 }
  0x4d   : > { %691 = vmatmul.mubr.f32.gmra.mxu1 %v3401_v7 }
  0x4e   : > { %696 = vmatprep.mubr.f32.mxu1 %v3165_v0 }
  0x4f   : > { %524 = vmatmul.mubr.f32.gmra.mxu0 %v3483_v63 }
  0x50   : > { %529 = vmatprep.mubr.f32.mxu0 %v3165_v0 }
  0x51   : > { %698 = vmatmul.mubr.f32.gmra.mxu1 %v3417_v17 }
  0x52   : > { %703 = vmatprep.mubr.f32.mxu1 %v3165_v0 }
  0x53   : > { %535 = vmatmul.mubr.f32.gmra.mxu0 %v3494_v14 }
  0x54   : > { %540 = vmatprep.mubr.f32.mxu0 %v3165_v0 }
  0x55   : > { %705 = vmatmul.mubr.f32.gmra.mxu1 %v3435_v35 }
  0x56   : > { %710 = vmatprep.mubr.f32.mxu1 %v3165_v0 }
  0x57   : > { %546 = vmatmul.mubr.f32.gmra.mxu0 %v3502_v18 }
  0x58   : > { %786 = vmatprep.mubr.f32.mxu0 %v3165_v0 }
  0x59   : > { %712 = vmatmul.mubr.f32.gmra.mxu1 %v3452_v46 }
  0x5a   : > { %957 = vmatprep.mubr.f32.mxu1 %v3165_v0 }
  0x5b   : > { %789 = vmatmul.mubr.f32.vlgmr.msra.gmra.mxu0 %v3284_v19 }
  0x5c   : > { %1112 = vmatpush1.msra.mxu0 %v590_v27  ;;  %794 = vmatprep.mubr.f32.mxu0 %v3165_v0 }
  0x5d   : > { %961 = vmatmul.mubr.f32.vlgmr.msra.gmra.mxu1 %v3300_v26  ;;  %2780 = vmatprep.subr.mxu0 %v3165_v0 }
  0x5e   : > { %1270 = vmatpush1.msra.mxu1 %v3272_v11  ;;  %966 = vmatprep.mubr.f32.mxu1 %v3165_v0  ;;  %v301_v11 = vld [vmem:[%s3261_s7 + $0x10] sm:$0xff] }
  0x5f   : > { %797 = vmatmul.mubr.f32.gmra.mxu0 %v3290_v21  ;;  %2821 = vmatprep.subr.mxu1 %v3165_v0  ;;  %v3553_v20 = vand.u32 4294901760, %v301_v11 }
  0x60   : > { %802 = vmatprep.mubr.f32.mxu0 %v3165_v0 }
  0x61   : > { %970 = vmatmul.mubr.f32.gmra.mxu1 %v3304_v28  ;;  %v3560_v27 = vsub.f32 %v301_v11, %v3553_v20 }
  0x62   : > { %975 = vmatprep.mubr.f32.mxu1 %v3165_v0 }
  0x63   : > { %805 = vmatmul.mubr.f32.gmra.mxu0 %v3295_v23  ;;  %v1624_v25 = vand.u32 4294901760, %v3560_v27 }
  0x64   : > { %810 = vmatprep.mubr.f32.mxu0 %v3165_v0 }
  0x65   : > { %979 = vmatmul.mubr.f32.gmra.mxu1 %v3307_v29  ;;  %v1625_v34 = vsub.f32 %v3560_v27, %v1624_v25 }
  0x66   : > { %984 = vmatprep.mubr.f32.mxu1 %v3165_v0 }
  0x67   : > { %813 = vmatmul.mubr.f32.gmra.mxu0 %v3310_v30  ;;  %v1626_v36 = vand.u32 4294901760, %v1625_v34 }
  0x68   : > { %818 = vmatprep.mubr.f32.mxu0 %v3165_v0 }
  0x69   : > { %988 = vmatmul.mubr.f32.gmra.mxu1 %v3333_v44 }
  0x6a   : > { %993 = vmatprep.mubr.f32.mxu1 %v3165_v0 }
  0x6b   : > { %821 = vmatmul.mubr.f32.gmra.mxu0 %v3336_v45 }
  0x6c   : > { %826 = vmatprep.mubr.f32.mxu0 %v3165_v0 }
  0x6d   : > { %997 = vmatmul.mubr.f32.gmra.mxu1 %v3354_v51 }
  0x6e   : > { %1002 = vmatprep.mubr.f32.mxu1 %v3165_v0 }
  0x6f   : > { %829 = vmatmul.mubr.f32.gmra.mxu0 %v3345_v48 }
  0x70   : > { %834 = vmatprep.mubr.f32.mxu0 %v3165_v0 }
  0x71   : > { %1006 = vmatmul.mubr.f32.gmra.mxu1 %v3364_v55 }
  0x72   : > { %1011 = vmatprep.mubr.f32.mxu1 %v3165_v0 }
  0x73   : > { %837 = vmatmul.mubr.f32.gmra.mxu0 %v3372_v58 }
  0x74   : > { %842 = vmatprep.mubr.f32.mxu0 %v3165_v0 }
  0x75   : > { %1015 = vmatmul.mubr.f32.gmra.mxu1 %v3388_v2 }
  0x76   : > { %1020 = vmatprep.mubr.f32.mxu1 %v3165_v0 }
  0x77   : > { %845 = vmatmul.mubr.f32.gmra.mxu0 %v3391_v3 }
  0x78   : > { %850 = vmatprep.mubr.f32.mxu0 %v3165_v0 }
  0x79   : > { %1024 = vmatmul.mubr.f32.gmra.mxu1 %v3407_v9 }
  0x7a   : > { %1029 = vmatprep.mubr.f32.mxu1 %v3165_v0 }
  0x7b   : > { %853 = vmatmul.mubr.f32.gmra.mxu0 %v3410_v10 }
  0x7c   : > { %858 = vmatprep.mubr.f32.mxu0 %v3165_v0 }
  0x7d   : > { %1033 = vmatmul.mubr.f32.gmra.mxu1 %v3426_v32 }
  0x7e   : > { %1038 = vmatprep.mubr.f32.mxu1 %v3165_v0 }
  0x7f   : > { %861 = vmatmul.mubr.f32.gmra.mxu0 %v3429_v33 }
  0x80   : > { %866 = vmatprep.mubr.f32.mxu0 %v3165_v0 }
  0x81   : > { %1042 = vmatmul.mubr.f32.gmra.mxu1 %v3444_v40 }
  0x82   : > { %1047 = vmatprep.mubr.f32.mxu1 %v3165_v0 }
  0x83   : > { %869 = vmatmul.mubr.f32.gmra.mxu0 %v3447_v43 }
  0x84   : > { %874 = vmatprep.mubr.f32.mxu0 %v3165_v0 }
  0x85   : > { %1051 = vmatmul.mubr.f32.gmra.mxu1 %v3460_v53 }
  0x86   : > { %1056 = vmatprep.mubr.f32.mxu1 %v3165_v0 }
  0x87   : > { %877 = vmatmul.mubr.f32.gmra.mxu0 %v3463_v54 }
  0x88   : > { %882 = vmatprep.mubr.f32.mxu0 %v3165_v0 }
  0x89   : > { %1060 = vmatmul.mubr.f32.gmra.mxu1 %v3474_v61 }
  0x8a   : > { %1065 = vmatprep.mubr.f32.mxu1 %v3165_v0 }
  0x8b   : > { %885 = vmatmul.mubr.f32.gmra.mxu0 %v3477_v62 }
  0x8c   : > { %1145 = vmatprep.mubr.f32.mxu0 %v3165_v0 }
  0x8d   : > { %1069 = vmatmul.mubr.f32.gmra.mxu1 %v3488_v8 }
  0x8e   : > { %1303 = vmatprep.mubr.f32.mxu1 %v3165_v0 }
  0x8f   : > { %1147 = vmatmul.mubr.f32.vlgmr.msra.gmra.mxu0 %v3274_v12 }
  0x90   : > { %2781 = vmatpush3.msra.mxu0 %v3553_v20  ;;  %1152 = vmatprep.mubr.f32.mxu0 %v3165_v0 }
  0x91   : > { %1305 = vmatmul.mubr.f32.vlgmr.msra.gmra.mxu1 %v3274_v12  ;;  %2862 = vmatprep.subr.mxu0 %v3165_v0 }
  0x92   : > { %2822 = vmatpush3.msra.mxu1 %v1626_v36  ;;  %1310 = vmatprep.mubr.f32.mxu1 %v3165_v0 }
  0x93   : > { %1154 = vmatmul.mubr.f32.gmra.mxu0 %v3276_v13  ;;  %2903 = vmatprep.subr.mxu1 %v3165_v0 }
  0x94   : > { %1159 = vmatprep.mubr.f32.mxu0 %v3165_v0 }
  0x95   : > { %1312 = vmatmul.mubr.f32.gmra.mxu1 %v3276_v13 }
  0x96   : > { %1317 = vmatprep.mubr.f32.mxu1 %v3165_v0 }
  0x97   : > { %1161 = vmatmul.mubr.f32.gmra.mxu0 %v3279_v15 }
  0x98   : > { %1166 = vmatprep.mubr.f32.mxu0 %v3165_v0 }
  0x99   : > { %1319 = vmatmul.mubr.f32.gmra.mxu1 %v3279_v15 }
  0x9a   : > { %1324 = vmatprep.mubr.f32.mxu1 %v3165_v0 }
  0x9b   : > { %1168 = vmatmul.mubr.f32.gmra.mxu0 %v3297_v24 }
  0x9c   : > { %1173 = vmatprep.mubr.f32.mxu0 %v3165_v0 }
  0x9d   : > { %1326 = vmatmul.mubr.f32.gmra.mxu1 %v3297_v24 }
  0x9e   : > { %1331 = vmatprep.mubr.f32.mxu1 %v3165_v0 }
  0x9f   : > { %1175 = vmatmul.mubr.f32.gmra.mxu0 %v3312_v31 }
  0xa0   : > { %1180 = vmatprep.mubr.f32.mxu0 %v3165_v0 }
  0xa1   : > { %1333 = vmatmul.mubr.f32.gmra.mxu1 %v3312_v31 }
  0xa2   : > { %1338 = vmatprep.mubr.f32.mxu1 %v3165_v0 }
  0xa3   : > { %1182 = vmatmul.mubr.f32.gmra.mxu0 %v3325_v41 }
  0xa4   : > { %1187 = vmatprep.mubr.f32.mxu0 %v3165_v0 }
  0xa5   : > { %1340 = vmatmul.mubr.f32.gmra.mxu1 %v3325_v41 }
  0xa6   : > { %1345 = vmatprep.mubr.f32.mxu1 %v3165_v0 }
  0xa7   : > { %1189 = vmatmul.mubr.f32.gmra.mxu0 %v3356_v52 }
  0xa8   : > { %1194 = vmatprep.mubr.f32.mxu0 %v3165_v0 }
  0xa9   : > { %1347 = vmatmul.mubr.f32.gmra.mxu1 %v3356_v52 }
  0xaa   : > { %1352 = vmatprep.mubr.f32.mxu1 %v3165_v0 }
  0xab   : > { %1196 = vmatmul.mubr.f32.gmra.mxu0 %v3374_v59 }
  0xac   : > { %1201 = vmatprep.mubr.f32.mxu0 %v3165_v0 }
  0xad   : > { %1354 = vmatmul.mubr.f32.gmra.mxu1 %v3374_v59 }
  0xae   : > { %1359 = vmatprep.mubr.f32.mxu1 %v3165_v0 }
  0xaf   : > { %1203 = vmatmul.mubr.f32.gmra.mxu0 %v3393_v4 }
  0xb0   : > { %1208 = vmatprep.mubr.f32.mxu0 %v3165_v0 }
  0xb1   : > { %1361 = vmatmul.mubr.f32.gmra.mxu1 %v3393_v4 }
  0xb2   : > { %1366 = vmatprep.mubr.f32.mxu1 %v3165_v0 }
  0xb3   : > { %1210 = vmatmul.mubr.f32.gmra.mxu0 %v3401_v7 }
  0xb4   : > { %1215 = vmatprep.mubr.f32.mxu0 %v3165_v0 }
  0xb5   : > { %1368 = vmatmul.mubr.f32.gmra.mxu1 %v3401_v7 }
  0xb6   : > { %1373 = vmatprep.mubr.f32.mxu1 %v3165_v0 }
  0xb7   : > { %1217 = vmatmul.mubr.f32.gmra.mxu0 %v3417_v17 }
  0xb8   : > { %1222 = vmatprep.mubr.f32.mxu0 %v3165_v0 }
  0xb9   : > { %1375 = vmatmul.mubr.f32.gmra.mxu1 %v3417_v17 }
  0xba   : > { %1380 = vmatprep.mubr.f32.mxu1 %v3165_v0 }
  0xbb   : > { %1224 = vmatmul.mubr.f32.gmra.mxu0 %v3435_v35 }
  0xbc   : > { %1229 = vmatprep.mubr.f32.mxu0 %v3165_v0 }
  0xbd   : > { %1382 = vmatmul.mubr.f32.gmra.mxu1 %v3435_v35 }
  0xbe   : > { %1387 = vmatprep.mubr.f32.mxu1 %v3165_v0 }
  0xbf   : > { %1231 = vmatmul.mubr.f32.gmra.mxu0 %v3452_v46 }
  0xc0   : > { %2782 = vmatprep.mubr.msk.f32.mxu0 %vm3166_vm1, %v3165_v0 }
  0xc1   : > { %1389 = vmatmul.mubr.f32.gmra.mxu1 %v3452_v46 }
  0xc2   : > { %2823 = vmatprep.mubr.msk.f32.mxu1 %vm3166_vm1, %v3165_v0 }
  0xc3   : > { %2783 = vmatmul.mubr.f32.vlgmr.msra.gmra.mxu0 %v3322_v38 }
  0xc4   : > { %2863 = vmatpush3.msra.mxu0 %v3560_v27  ;;  %2785 = vmatprep.mubr.msk.f32.mxu0 %vm3166_vm1, %v3165_v0 }
  0xc5   : > { %2824 = vmatmul.mubr.f32.vlgmr.msra.gmra.mxu1 %v3274_v12  ;;  %2944 = vmatprep.subr.mxu0 %v3165_v0 }
  0xc6   : > { %2904 = vmatpush3.msra.mxu1 %v3553_v20  ;;  %2826 = vmatprep.mubr.msk.f32.mxu1 %vm3166_vm1, %v3165_v0 }
  0xc7   : > { %2786 = vmatmul.mubr.f32.gmra.mxu0 %v3328_v42  ;;  %2985 = vmatprep.subr.mxu1 %v3165_v0 }
  0xc8   : > { %2788 = vmatprep.mubr.msk.f32.mxu0 %vm3166_vm1, %v3165_v0 }
  0xc9   : > { %2827 = vmatmul.mubr.f32.gmra.mxu1 %v3276_v13 }
  0xca   : > { %2829 = vmatprep.mubr.msk.f32.mxu1 %vm3166_vm1, %v3165_v0 }
  0xcb   : > { %2789 = vmatmul.mubr.f32.gmra.mxu0 %v3349_v49 }
  0xcc   : > { %2791 = vmatprep.mubr.msk.f32.mxu0 %vm3166_vm1, %v3165_v0 }
  0xcd   : > { %2830 = vmatmul.mubr.f32.gmra.mxu1 %v3279_v15 }
  0xce   : > { %2832 = vmatprep.mubr.msk.f32.mxu1 %vm3166_vm1, %v3165_v0 }
  0xcf   : > { %2792 = vmatmul.mubr.f32.gmra.mxu0 %v3367_v56 }
  0xd0   : > { %2794 = vmatprep.mubr.msk.f32.mxu0 %vm3166_vm1, %v3165_v0 }
  0xd1   : > { %2833 = vmatmul.mubr.f32.gmra.mxu1 %v3297_v24 }
  0xd2   : > { %2835 = vmatprep.mubr.msk.f32.mxu1 %vm3166_vm1, %v3165_v0 }
  0xd3   : > { %2795 = vmatmul.mubr.f32.gmra.mxu0 %v3385_v1 }
  0xd4   : > { %2797 = vmatprep.mubr.msk.f32.mxu0 %vm3166_vm1, %v3165_v0 }
  0xd5   : > { %2836 = vmatmul.mubr.f32.gmra.mxu1 %v3312_v31 }
  0xd6   : > { %2838 = vmatprep.mubr.msk.f32.mxu1 %vm3166_vm1, %v3165_v0 }
  0xd7   : > { %2798 = vmatmul.mubr.f32.gmra.mxu0 %v3399_v6 }
  0xd8   : > { %2800 = vmatprep.mubr.msk.f32.mxu0 %vm3166_vm1, %v3165_v0 }
  0xd9   : > { %2839 = vmatmul.mubr.f32.gmra.mxu1 %v3325_v41 }
  0xda   : > { %2841 = vmatprep.mubr.msk.f32.mxu1 %vm3166_vm1, %v3165_v0 }
  0xdb   : > { %2801 = vmatmul.mubr.f32.gmra.mxu0 %v3421_v22 }
  0xdc   : > { %2803 = vmatprep.mubr.msk.f32.mxu0 %vm3166_vm1, %v3165_v0 }
  0xdd   : > { %2842 = vmatmul.mubr.f32.gmra.mxu1 %v3356_v52 }
  0xde   : > { %2844 = vmatprep.mubr.msk.f32.mxu1 %vm3166_vm1, %v3165_v0 }
  0xdf   : > { %2804 = vmatmul.mubr.f32.gmra.mxu0 %v3439_v37 }
  0xe0   : > { %2806 = vmatprep.mubr.msk.f32.mxu0 %vm3166_vm1, %v3165_v0 }
  0xe1   : > { %2845 = vmatmul.mubr.f32.gmra.mxu1 %v3374_v59 }
  0xe2   : > { %2847 = vmatprep.mubr.msk.f32.mxu1 %vm3166_vm1, %v3165_v0 }
  0xe3   : > { %2807 = vmatmul.mubr.f32.gmra.mxu0 %v3455_v47 }
  0xe4   : > { %2809 = vmatprep.mubr.msk.f32.mxu0 %vm3166_vm1, %v3165_v0 }
  0xe5   : > { %2848 = vmatmul.mubr.f32.gmra.mxu1 %v3393_v4 }
  0xe6   : > { %2850 = vmatprep.mubr.msk.f32.mxu1 %vm3166_vm1, %v3165_v0 }
  0xe7   : > { %v415_v38 = vpop.f32.mrf.mxu0  ;;  %2810 = vmatmul.mubr.f32.gmra.mxu0 %v3469_v57 }
  0xe8   : > { %2812 = vmatprep.mubr.msk.f32.mxu0 %vm3166_vm1, %v3165_v0 }
  0xe9   : > { %v629_v42 = vpop.f32.mrf.mxu1  ;;  %2851 = vmatmul.mubr.f32.gmra.mxu1 %v3401_v7  ;;  %v417_v49 = vpop.f32.mrf.mxu0 }
  0xea   : > { %v3697_v56 = vadd.f32 %v629_v42, %v415_v38  ;;  %2853 = vmatprep.mubr.msk.f32.mxu1 %vm3166_vm1, %v3165_v0 }
  0xeb   : > { %v631_v1 = vpop.f32.mrf.mxu1  ;;  %v426_v6 = vpop.f32.mrf.mxu0  ;;  %2813 = vmatmul.mubr.f32.gmra.mxu0 %v3483_v63 }
  0xec   : > { %v3702_v22 = vadd.f32 %v631_v1, %v417_v49  ;;  %2815 = vmatprep.mubr.msk.f32.mxu0 %vm3166_vm1, %v3165_v0 }
  0xed   : > { %v636_v37 = vpop.f32.mrf.mxu1  ;;  %2854 = vmatmul.mubr.f32.gmra.mxu1 %v3417_v17  ;;  %v428_v39 = vpop.f32.mrf.mxu0 }
  0xee   : > { %v3707_v47 = vadd.f32 %v636_v37, %v426_v6  ;;  %2856 = vmatprep.mubr.msk.f32.mxu1 %vm3166_vm1, %v3165_v0 }
  0xef   : > { %v638_v50 = vpop.f32.mrf.mxu1  ;;  %v437_v57 = vpop.f32.mrf.mxu0  ;;  %2816 = vmatmul.mubr.f32.gmra.mxu0 %v3494_v14 }
  0xf0   : > { %v3712_v60 = vadd.f32 %v638_v50, %v428_v39  ;;  %2818 = vmatprep.mubr.msk.f32.mxu0 %vm3166_vm1, %v3165_v0 }
  0xf1   : > { %v643_v63 = vpop.f32.mrf.mxu1  ;;  %2857 = vmatmul.mubr.f32.gmra.mxu1 %v3435_v35  ;;  %v439_v5 = vpop.f32.mrf.mxu0 }
  0xf2   : > { %v3717_v16 = vadd.f32 %v643_v63, %v437_v57  ;;  %2859 = vmatprep.mubr.msk.f32.mxu1 %vm3166_vm1, %v3165_v0 }
  0xf3   : > { %v645_v11 = vpop.f32.mrf.mxu1  ;;  %v448_v34 = vpop.f32.mrf.mxu0  ;;  %2819 = vmatmul.mubr.f32.gmra.mxu0 %v3502_v18 }
  0xf4   : > { %v3722_v36 = vadd.f32 %v645_v11, %v439_v5  ;;  %2864 = vmatprep.mubr.msk.f32.mxu0 %vm3166_vm1, %v3165_v0 }
  0xf5   : > { %v650_v14 = vpop.f32.mrf.mxu1  ;;  %2860 = vmatmul.mubr.f32.gmra.mxu1 %v3452_v46  ;;  %v450_v38 = vpop.f32.mrf.mxu0 }
  0xf6   : > { %v3727_v42 = vadd.f32 %v650_v14, %v448_v34  ;;  %2905 = vmatprep.mubr.msk.f32.mxu1 %vm3166_vm1, %v3165_v0 }
  0xf7   : > { %v652_v49 = vpop.f32.mrf.mxu1  ;;  %v459_v1 = vpop.f32.mrf.mxu0  ;;  %2865 = vmatmul.mubr.f32.vlgmr.msra.gmra.mxu0 %v3284_v19 }
  0xf8   : > { %v3732_v6 = vadd.f32 %v652_v49, %v450_v38  ;;  %2945 = vmatpush3.msra.mxu0 %v1624_v25  ;;  %2867 = vmatprep.mubr.msk.f32.mxu0 %vm3166_vm1, %v3165_v0 }
  0xf9   : > { %v657_v18 = vpop.f32.mrf.mxu1  ;;  %2906 = vmatmul.mubr.f32.vlgmr.msra.gmra.mxu1 %v3300_v26  ;;  %v461_v37 = vpop.f32.mrf.mxu0 }
  0xfa   : > { %v3739_v39 = vadd.f32 %v657_v18, %v459_v1  ;;  %2986 = vmatpush3.msra.mxu1 %v3553_v20  ;;  %2908 = vmatprep.mubr.msk.f32.mxu1 %vm3166_vm1, %v3165_v0 }
  0xfb   : > { %v659_v19 = vpop.f32.mrf.mxu1  ;;  %v470_v50 = vpop.f32.mrf.mxu0  ;;  %2868 = vmatmul.mubr.f32.gmra.mxu0 %v3290_v21 }
  0xfc   : > { %v3745_v27 = vadd.f32 %v659_v19, %v461_v37  ;;  %2870 = vmatprep.mubr.msk.f32.mxu0 %vm3166_vm1, %v3165_v0 }
  0xfd   : > { %v664_v25 = vpop.f32.mrf.mxu1  ;;  %2909 = vmatmul.mubr.f32.gmra.mxu1 %v3304_v28  ;;  %v472_v26 = vpop.f32.mrf.mxu0 }
  0xfe   : > { %v3750_v57 = vadd.f32 %v664_v25, %v470_v50  ;;  %2911 = vmatprep.mubr.msk.f32.mxu1 %vm3166_vm1, %v3165_v0 }
  0xff   : > { %v666_v20 = vpop.f32.mrf.mxu1  ;;  %v481_v63 = vpop.f32.mrf.mxu0  ;;  %2871 = vmatmul.mubr.f32.gmra.mxu0 %v3295_v23 }
 0x100   : > { %v3755_v5 = vadd.f32 %v666_v20, %v472_v26  ;;  %2873 = vmatprep.mubr.msk.f32.mxu0 %vm3166_vm1, %v3165_v0 }
 0x101   : > { %v671_v21 = vpop.f32.mrf.mxu1  ;;  %2912 = vmatmul.mubr.f32.gmra.mxu1 %v3307_v29  ;;  %v483_v11 = vpop.f32.mrf.mxu0 }
 0x102   : > { %v3760_v28 = vadd.f32 %v671_v21, %v481_v63  ;;  %2914 = vmatprep.mubr.msk.f32.mxu1 %vm3166_vm1, %v3165_v0 }
 0x103   : > { %v673_v34 = vpop.f32.mrf.mxu1  ;;  %v492_v14 = vpop.f32.mrf.mxu0  ;;  %2874 = vmatmul.mubr.f32.gmra.mxu0 %v3310_v30 }
 0x104   : > { %v3765_v38 = vadd.f32 %v673_v34, %v483_v11  ;;  %2876 = vmatprep.mubr.msk.f32.mxu0 %vm3166_vm1, %v3165_v0 }
 0x105   : > { %v678_v23 = vpop.f32.mrf.mxu1  ;;  %2915 = vmatmul.mubr.f32.gmra.mxu1 %v3333_v44  ;;  %v494_v49 = vpop.f32.mrf.mxu0 }
 0x106   : > { %v3770_v29 = vadd.f32 %v678_v23, %v492_v14  ;;  %2917 = vmatprep.mubr.msk.f32.mxu1 %vm3166_vm1, %v3165_v0 }
 0x107   : > { %v680_v1 = vpop.f32.mrf.mxu1  ;;  %v503_v18 = vpop.f32.mrf.mxu0  ;;  %2877 = vmatmul.mubr.f32.gmra.mxu0 %v3336_v45 }
 0x108   : > { %v3775_v37 = vadd.f32 %v680_v1, %v494_v49  ;;  %2879 = vmatprep.mubr.msk.f32.mxu0 %vm3166_vm1, %v3165_v0 }
 0x109   : > { %v685_v30 = vpop.f32.mrf.mxu1  ;;  %2918 = vmatmul.mubr.f32.gmra.mxu1 %v3354_v51  ;;  %v505_v19 = vpop.f32.mrf.mxu0 }
 0x10a   : > { %v3780_v44 = vadd.f32 %v685_v30, %v503_v18  ;;  %2920 = vmatprep.mubr.msk.f32.mxu1 %vm3166_vm1, %v3165_v0 }
 0x10b   : > { %v687_v50 = vpop.f32.mrf.mxu1  ;;  %v514_v25 = vpop.f32.mrf.mxu0  ;;  %2880 = vmatmul.mubr.f32.gmra.mxu0 %v3345_v48 }
 0x10c   : > { %v3785_v26 = vadd.f32 %v687_v50, %v505_v19  ;;  %2882 = vmatprep.mubr.msk.f32.mxu0 %vm3166_vm1, %v3165_v0 }
 0x10d   : > { %v692_v45 = vpop.f32.mrf.mxu1  ;;  %2921 = vmatmul.mubr.f32.gmra.mxu1 %v3364_v55  ;;  %v516_v20 = vpop.f32.mrf.mxu0 }
 0x10e   : > { %v3790_v51 = vadd.f32 %v692_v45, %v514_v25  ;;  %2923 = vmatprep.mubr.msk.f32.mxu1 %vm3166_vm1, %v3165_v0 }
 0x10f   : > { %v694_v63 = vpop.f32.mrf.mxu1  ;;  %v525_v21 = vpop.f32.mrf.mxu0  ;;  %2883 = vmatmul.mubr.f32.gmra.mxu0 %v3372_v58 }
 0x110   : > { %v3795_v11 = vadd.f32 %v694_v63, %v516_v20  ;;  %2885 = vmatprep.mubr.msk.f32.mxu0 %vm3166_vm1, %v3165_v0 }
 0x111   : > { %v699_v48 = vpop.f32.mrf.mxu1  ;;  %2924 = vmatmul.mubr.f32.gmra.mxu1 %v3388_v2  ;;  %v527_v34 = vpop.f32.mrf.mxu0 }
 0x112   : > { %v3800_v55 = vadd.f32 %v699_v48, %v525_v21  ;;  %2926 = vmatprep.mubr.msk.f32.mxu1 %vm3166_vm1, %v3165_v0 }
 0x113   : > { %v701_v14 = vpop.f32.mrf.mxu1  ;;  %v536_v23 = vpop.f32.mrf.mxu0  ;;  %2886 = vmatmul.mubr.f32.gmra.mxu0 %v3391_v3 }
 0x114   : > { %v3805_v49 = vadd.f32 %v701_v14, %v527_v34  ;;  %2888 = vmatprep.mubr.msk.f32.mxu0 %vm3166_vm1, %v3165_v0 }
 0x115   : > { %v706_v58 = vpop.f32.mrf.mxu1  ;;  %2927 = vmatmul.mubr.f32.gmra.mxu1 %v3407_v9  ;;  %v538_v1 = vpop.f32.mrf.mxu0 }
 0x116   : > { %v3810_v2 = vadd.f32 %v706_v58, %v536_v23  ;;  %2929 = vmatprep.mubr.msk.f32.mxu1 %vm3166_vm1, %v3165_v0 }
 0x117   : > { %v708_v18 = vpop.f32.mrf.mxu1  ;;  %v547_v30 = vpop.f32.mrf.mxu0  ;;  %2889 = vmatmul.mubr.f32.gmra.mxu0 %v3410_v10 }
 0x118   : > { %v3815_v19 = vadd.f32 %v708_v18, %v538_v1  ;;  %2891 = vmatprep.mubr.msk.f32.mxu0 %vm3166_vm1, %v3165_v0 }
 0x119   : > { %v713_v3 = vpop.f32.mrf.mxu1  ;;  %2930 = vmatmul.mubr.f32.gmra.mxu1 %v3426_v32  ;;  %v549_v50 = vpop.f32.mrf.mxu0 }
 0x11a   : > { %v3820_v9 = vadd.f32 %v713_v3, %v547_v30  ;;  %2932 = vmatprep.mubr.msk.f32.mxu1 %vm3166_vm1, %v3165_v0 }
 0x11b   : > { %v715_v25 = vpop.f32.mrf.mxu1  ;;  %v790_v45 = vpop.f32.mrf.mxu0  ;;  %2892 = vmatmul.mubr.f32.gmra.mxu0 %v3429_v33 }
 0x11c   : > { %4398 = vst [vmem:[#allocation6_spill] sm:$0xff] %v3820_v9  ;;  %v3825_v20 = vadd.f32 %v715_v25, %v549_v50  ;;  %v791_v10 = vadd.f32 %v790_v45, %v3697_v56  ;;  %2894 = vmatprep.mubr.msk.f32.mxu0 %vm3166_vm1, %v3165_v0 }
 0x11d   : > { %v962_v63 = vpop.f32.mrf.mxu1  ;;  %2933 = vmatmul.mubr.f32.gmra.mxu1 %v3444_v40  ;;  %v792_v32 = vpop.f32.mrf.mxu0 }
 0x11e   : > { %4399 = vst [vmem:[#allocation7_spill] sm:$0xff] %v3825_v20  ;;  %v3831_v21 = vadd.f32 %v962_v63, %v791_v10  ;;  %v793_v48 = vadd.f32 %v792_v32, %v3702_v22  ;;  %2935 = vmatprep.mubr.msk.f32.mxu1 %vm3166_vm1, %v3165_v0 }
 0x11f   : > { %v964_v34 = vpop.f32.mrf.mxu1  ;;  %v798_v33 = vpop.f32.mrf.mxu0  ;;  %2895 = vmatmul.mubr.f32.gmra.mxu0 %v3447_v43 }
 0x120   : > { %v3837_v14 = vadd.f32 %v964_v34, %v793_v48  ;;  %v799_v56 = vadd.f32 %v798_v33, %v3707_v47  ;;  %2897 = vmatprep.mubr.msk.f32.mxu0 %vm3166_vm1, %v3165_v0 }
 0x121   : > { %v971_v40 = vpop.f32.mrf.mxu1  ;;  %2936 = vmatmul.mubr.f32.gmra.mxu1 %v3460_v53  ;;  %v800_v23 = vpop.f32.mrf.mxu0 }
 0x122   : > { %v3843_v58 = vadd.f32 %v971_v40, %v799_v56  ;;  %v801_v22 = vadd.f32 %v800_v23, %v3712_v60  ;;  %2938 = vmatprep.mubr.msk.f32.mxu1 %vm3166_vm1, %v3165_v0 }
 0x123   : > { %v973_v1 = vpop.f32.mrf.mxu1  ;;  %v806_v43 = vpop.f32.mrf.mxu0  ;;  %2898 = vmatmul.mubr.f32.gmra.mxu0 %v3463_v54 }
 0x124   : > { %v3849_v18 = vadd.f32 %v973_v1, %v801_v22  ;;  %v807_v47 = vadd.f32 %v806_v43, %v3717_v16  ;;  %2900 = vmatprep.mubr.msk.f32.mxu0 %vm3166_vm1, %v3165_v0 }
 0x125   : > { %v980_v53 = vpop.f32.mrf.mxu1  ;;  %2939 = vmatmul.mubr.f32.gmra.mxu1 %v3474_v61  ;;  %v808_v30 = vpop.f32.mrf.mxu0 }
 0x126   : > { %v3855_v3 = vadd.f32 %v980_v53, %v807_v47  ;;  %v809_v60 = vadd.f32 %v808_v30, %v3722_v36  ;;  %2941 = vmatprep.mubr.msk.f32.mxu1 %vm3166_vm1, %v3165_v0 }
 0x127   : > { %v982_v50 = vpop.f32.mrf.mxu1  ;;  %v814_v54 = vpop.f32.mrf.mxu0  ;;  %2901 = vmatmul.mubr.f32.gmra.mxu0 %v3477_v62 }
 0x128   : > { %v3861_v25 = vadd.f32 %v982_v50, %v809_v60  ;;  %v815_v16 = vadd.f32 %v814_v54, %v3727_v42  ;;  %2946 = vmatprep.mubr.msk.f32.mxu0 %vm3166_vm1, %v3165_v0 }
 0x129   : > { %v989_v61 = vpop.f32.mrf.mxu1  ;;  %2942 = vmatmul.mubr.f32.gmra.mxu1 %v3488_v8  ;;  %v816_v45 = vpop.f32.mrf.mxu0 }
 0x12a   : > { %v3867_v10 = vadd.f32 %v989_v61, %v815_v16  ;;  %v817_v36 = vadd.f32 %v816_v45, %v3732_v6  ;;  %2987 = vmatprep.mubr.msk.f32.mxu1 %vm3166_vm1, %v3165_v0 }
 0x12b   : > { %v991_v63 = vpop.f32.mrf.mxu1  ;;  %v822_v62 = vpop.f32.mrf.mxu0  ;;  %2947 = vmatmul.mubr.f32.vlgmr.msra.gmra.mxu0 %v3274_v12 }
 0x12c   : > { %v3873_v32 = vadd.f32 %v991_v63, %v817_v36  ;;  %v823_v42 = vadd.f32 %v822_v62, %v3739_v39  ;;  %2949 = vmatprep.mubr.msk.f32.mxu0 %vm3166_vm1, %v3165_v0 }
 0x12d   : > { %v998_v8 = vpop.f32.mrf.mxu1  ;;  %2988 = vmatmul.mubr.f32.vlgmr.msra.gmra.mxu1 %v3274_v12  ;;  %v824_v48 = vpop.f32.mrf.mxu0 }
 0x12e   : > { %v3879_v34 = vadd.f32 %v998_v8, %v823_v42  ;;  %v825_v6 = vadd.f32 %v824_v48, %v3745_v27  ;;  %2990 = vmatprep.mubr.msk.f32.mxu1 %vm3166_vm1, %v3165_v0 }
 0x12f   : > { %v1000_v33 = vpop.f32.mrf.mxu1  ;;  %v3884_v56 = vpop.f32.mrf.mxu0  ;;  %2950 = vmatmul.mubr.f32.gmra.mxu0 %v3276_v13 }
 0x130   : > { %v3887_v39 = vadd.f32 %v1000_v33, %v825_v6  ;;  %2952 = vmatprep.mubr.msk.f32.mxu0 %vm3166_vm1, %v3165_v0 }
 0x131   : > { %v3891_v40 = vpop.f32.mrf.mxu1  ;;  %2991 = vmatmul.mubr.f32.gmra.mxu1 %v3276_v13  ;;  %v3894_v12 = vpop.f32.mrf.mxu0 }
 0x132   : > { %2993 = vmatprep.mubr.msk.f32.mxu1 %vm3166_vm1, %v3165_v0 }
 0x133   : > { %v3898_v27 = vpop.f32.mrf.mxu1  ;;  %v3900_v23 = vpop.f32.mrf.mxu0  ;;  %2953 = vmatmul.mubr.f32.gmra.mxu0 %v3279_v15 }
 0x134   : > { %2955 = vmatprep.mubr.msk.f32.mxu0 %vm3166_vm1, %v3165_v0 }
 0x135   : > { %v3905_v22 = vpop.f32.mrf.mxu1  ;;  %2994 = vmatmul.mubr.f32.gmra.mxu1 %v3279_v15  ;;  %v3908_v1 = vpop.f32.mrf.mxu0 }
 0x136   : > { %2996 = vmatprep.mubr.msk.f32.mxu1 %vm3166_vm1, %v3165_v0 }
 0x137   : > { %v3912_v13 = vpop.f32.mrf.mxu1  ;;  %v3914_v43 = vpop.f32.mrf.mxu0  ;;  %2956 = vmatmul.mubr.f32.gmra.mxu0 %v3297_v24 }
 0x138   : > { %2958 = vmatprep.mubr.msk.f32.mxu0 %vm3166_vm1, %v3165_v0 }
 0x139   : > { %v3919_v47 = vpop.f32.mrf.mxu1  ;;  %2997 = vmatmul.mubr.f32.gmra.mxu1 %v3297_v24  ;;  %v3922_v53 = vpop.f32.mrf.mxu0 }
 0x13a   : > { %2999 = vmatprep.mubr.msk.f32.mxu1 %vm3166_vm1, %v3165_v0 }
 0x13b   : > { %v3926_v15 = vpop.f32.mrf.mxu1  ;;  %v3928_v30 = vpop.f32.mrf.mxu0  ;;  %2959 = vmatmul.mubr.f32.gmra.mxu0 %v3312_v31 }
 0x13c   : > { %2961 = vmatprep.mubr.msk.f32.mxu0 %vm3166_vm1, %v3165_v0 }
 0x13d   : > { %v3933_v60 = vpop.f32.mrf.mxu1  ;;  %3000 = vmatmul.mubr.f32.gmra.mxu1 %v3312_v31  ;;  %v3936_v50 = vpop.f32.mrf.mxu0 }
 0x13e   : > { %3002 = vmatprep.mubr.msk.f32.mxu1 %vm3166_vm1, %v3165_v0 }
 0x13f   : > { %v3940_v24 = vpop.f32.mrf.mxu1  ;;  %v3942_v54 = vpop.f32.mrf.mxu0  ;;  %2962 = vmatmul.mubr.f32.gmra.mxu0 %v3325_v41 }
 0x140   : > { %2964 = vmatprep.mubr.msk.f32.mxu0 %vm3166_vm1, %v3165_v0 }
 0x141   : > { %v3947_v16 = vpop.f32.mrf.mxu1  ;;  %3003 = vmatmul.mubr.f32.gmra.mxu1 %v3325_v41  ;;  %v3950_v61 = vpop.f32.mrf.mxu0 }
 0x142   : > { %3005 = vmatprep.mubr.msk.f32.mxu1 %vm3166_vm1, %v3165_v0 }
 0x143   : > { %v3954_v31 = vpop.f32.mrf.mxu1  ;;  %v3956_v45 = vpop.f32.mrf.mxu0  ;;  %2965 = vmatmul.mubr.f32.gmra.mxu0 %v3356_v52 }
 0x144   : > { %2967 = vmatprep.mubr.msk.f32.mxu0 %vm3166_vm1, %v3165_v0 }
 0x145   : > { %v3961_v36 = vpop.f32.mrf.mxu1  ;;  %3006 = vmatmul.mubr.f32.gmra.mxu1 %v3356_v52  ;;  %v3964_v63 = vpop.f32.mrf.mxu0 }
 0x146   : > { %3008 = vmatprep.mubr.msk.f32.mxu1 %vm3166_vm1, %v3165_v0 }
 0x147   : > { %v3968_v41 = vpop.f32.mrf.mxu1  ;;  %v3970_v62 = vpop.f32.mrf.mxu0  ;;  %2968 = vmatmul.mubr.f32.gmra.mxu0 %v3374_v59 }
 0x148   : > { %2970 = vmatprep.mubr.msk.f32.mxu0 %vm3166_vm1, %v3165_v0 }
 0x149   : > { %v3975_v42 = vpop.f32.mrf.mxu1  ;;  %3009 = vmatmul.mubr.f32.gmra.mxu1 %v3374_v59  ;;  %v3978_v8 = vpop.f32.mrf.mxu0 }
 0x14a   : > { %4400 = vst [vmem:[#allocation8_spill] sm:$0xff] %v3975_v42  ;;  %3011 = vmatprep.mubr.msk.f32.mxu1 %vm3166_vm1, %v3165_v0 }
 0x14b   : > { %v3982_v52 = vpop.f32.mrf.mxu1  ;;  %v3984_v48 = vpop.f32.mrf.mxu0  ;;  %2971 = vmatmul.mubr.f32.gmra.mxu0 %v3393_v4 }
 0x14c   : > { %4401 = vst [vmem:[#allocation9_spill] sm:$0xff] %v3982_v52  ;;  %4402 = vst [vmem:[#allocation10_spill] sm:$0xff] %v3984_v48  ;;  %2973 = vmatprep.mubr.msk.f32.mxu0 %vm3166_vm1, %v3165_v0 }
 0x14d   : > { %v3989_v6 = vpop.f32.mrf.mxu1  ;;  %3012 = vmatmul.mubr.f32.gmra.mxu1 %v3393_v4  ;;  %v3992_v33 = vpop.f32.mrf.mxu0 }
 0x14e   : > { %4403 = vst [vmem:[#allocation11_spill] sm:$0xff] %v3989_v6  ;;  %4404 = vst [vmem:[#allocation12_spill] sm:$0xff] %v3992_v33  ;;  %3014 = vmatprep.mubr.msk.f32.mxu1 %vm3166_vm1, %v3165_v0 }
 0x14f   : > { %v3996_v59 = vpop.f32.mrf.mxu1  ;;  %v1148_v20 = vpop.f32.mrf.mxu0  ;;  %2974 = vmatmul.mubr.f32.gmra.mxu0 %v3401_v7 }
 0x150   : > { %4405 = vst [vmem:[#allocation13_spill] sm:$0xff] %v3996_v59  ;;  %v1149_v52 = vadd.f32 %v1148_v20, %v3831_v21  ;;  %2976 = vmatprep.mubr.msk.f32.mxu0 %vm3166_vm1, %v3165_v0 }
 0x151   : > { %v1306_v48 = vpop.f32.mrf.mxu1  ;;  %3015 = vmatmul.mubr.f32.gmra.mxu1 %v3401_v7  ;;  %v1150_v6 = vpop.f32.mrf.mxu0 }
 0x152   : > { %v1151_v4 = vadd.f32 %v1150_v6, %v3837_v14  ;;  %3017 = vmatprep.mubr.msk.f32.mxu1 %vm3166_vm1, %v3165_v0  ;;  %v4007_v59 = vadd.f32 %v1306_v48, %v1149_v52  ;;  %v831_v52 = vadd.f32 %v3884_v56, %v3750_v57 }
 0x153   : > { %v1308_v33 = vpop.f32.mrf.mxu1  ;;  %v1155_v9 = vpop.f32.mrf.mxu0  ;;  %2977 = vmatmul.mubr.f32.gmra.mxu0 %v3417_v17 }
 0x154   : > { %v4009_v42 = vadd.f32 %v1308_v33, %v1151_v4  ;;  %v1156_v20 = vadd.f32 %v1155_v9, %v3843_v58  ;;  %2979 = vmatprep.mubr.msk.f32.mxu0 %vm3166_vm1, %v3165_v0 }
 0x155   : > { %v1313_v7 = vpop.f32.mrf.mxu1  ;;  %3018 = vmatmul.mubr.f32.gmra.mxu1 %v3417_v17  ;;  %v1157_v21 = vpop.f32.mrf.mxu0 }
 0x156   : > { %v4015_v14 = vadd.f32 %v1313_v7, %v1156_v20  ;;  %v1158_v6 = vadd.f32 %v1157_v21, %v3849_v18  ;;  %3020 = vmatprep.mubr.msk.f32.mxu1 %vm3166_vm1, %v3165_v0 }
 0x157   : > { %v1315_v48 = vpop.f32.mrf.mxu1  ;;  %v1162_v33 = vpop.f32.mrf.mxu0  ;;  %2980 = vmatmul.mubr.f32.gmra.mxu0 %v3435_v35 }
 0x158   : > { %v2422_v9 = vmin.f32 %v4007_v59, %v4015_v14  ;;  %v4025_v58 = vadd.f32 %v1315_v48, %v1158_v6  ;;  %v1163_v17 = vadd.f32 %v1162_v33, %v3855_v3  ;;  %2982 = vmatprep.mubr.msk.f32.mxu0 %vm3166_vm1, %v3165_v0 }
 0x159   : > { %v1320_v18 = vpop.f32.mrf.mxu1  ;;  %3021 = vmatmul.mubr.f32.gmra.mxu1 %v3435_v35  ;;  %v1164_v4 = vpop.f32.mrf.mxu0 }
 0x15a   : > { %v2423_v7 = vmin.f32 %v4009_v42, %v4025_v58  ;;  %v4035_v21 = vadd.f32 %v1320_v18, %v1163_v17  ;;  %v1165_v6 = vadd.f32 %v1164_v4, %v3861_v25  ;;  %3023 = vmatprep.mubr.msk.f32.mxu1 %vm3166_vm1, %v3165_v0 }
 0x15b   : > { %v1322_v3 = vpop.f32.mrf.mxu1  ;;  %v1169_v48 = vpop.f32.mrf.mxu0  ;;  %2983 = vmatmul.mubr.f32.gmra.mxu0 %v3452_v46 }
 0x15c   : > { %v2425_v35 = vmin.f32 %v2422_v9, %v4035_v21  ;;  %v4042_v33 = vadd.f32 %v1322_v3, %v1165_v6  ;;  %v1170_v20 = vadd.f32 %v1169_v48, %v3867_v10  ;;  %v833_v6 = vadd.f32 %v3894_v12, %v3755_v5 }
 0x15d   : > { %v1327_v17 = vpop.f32.mrf.mxu1  ;;  %3024 = vmatmul.mubr.f32.gmra.mxu1 %v3452_v46  ;;  %v1171_v25 = vpop.f32.mrf.mxu0 }
 0x15e   : > { %v2426_v18 = vmin.f32 %v2423_v7, %v4042_v33  ;;  %v4049_v0 = vadd.f32 %v1327_v17, %v1170_v20  ;;  %v1172_v4 = vadd.f32 %v1171_v25, %v3873_v32  ;;  %v1008_v7 = vadd.f32 %v3891_v40, %v831_v52 }
 0x15f   : > { %v1329_v10 = vpop.f32.mrf.mxu1  ;;  %v1176_v3 = vpop.f32.mrf.mxu0  ;;  %v839_v20 = vadd.f32 %v3900_v23, %v3760_v28  ;;  %v1010_v25 = vadd.f32 %v3898_v27, %v833_v6  ;;  %v841_v40 = vadd.f32 %v3908_v1, %v3765_v38  ;;  %v849_v1 = vadd.f32 %v3922_v53, %v3775_v37 }
 0x160   : > { %v2428_v57 = vmin.f32 %v2425_v35, %v4049_v0  ;;  %v4057_v56 = vadd.f32 %v1329_v10, %v1172_v4  ;;  %v1177_v46 = vadd.f32 %v1176_v3, %v3879_v34 }
 0x161   : > { %v1334_v32 = vpop.f32.mrf.mxu1  ;;  %v1178_v48 = vpop.f32.mrf.mxu0  ;;  %v1017_v10 = vadd.f32 %v3905_v22, %v839_v20  ;;  %v1019_v22 = vadd.f32 %v3912_v13, %v841_v40 }
 0x162   : > { %v2429_v5 = vmin.f32 %v2426_v18, %v4057_v56  ;;  %v4066_v12 = vadd.f32 %v1334_v32, %v1177_v46  ;;  %v1179_v35 = vadd.f32 %v1178_v48, %v3887_v39  ;;  %v847_v18 = vadd.f32 %v3914_v43, %v3770_v29 }
 0x163   : > { %v1336_v4 = vpop.f32.mrf.mxu1  ;;  %v1183_v34 = vpop.f32.mrf.mxu0  ;;  %v855_v48 = vadd.f32 %v3928_v30, %v3780_v44 }
 0x164   : > { %v2431_v28 = vmin.f32 %v2428_v57, %v4066_v12  ;;  %v4073_v23 = vadd.f32 %v1336_v4, %v1179_v35  ;;  %v1184_v52 = vadd.f32 %v1183_v34, %v1008_v7  ;;  %v1026_v32 = vadd.f32 %v3919_v47, %v847_v18 }
 0x165   : > { %v1341_v3 = vpop.f32.mrf.mxu1  ;;  %v1185_v46 = vpop.f32.mrf.mxu0  ;;  %v1028_v4 = vadd.f32 %v3926_v15, %v849_v1  ;;  %v857_v47 = vadd.f32 %v3936_v50, %v3785_v26  ;;  %v865_v50 = vadd.f32 %v3950_v61, %v3795_v11 }
 0x166   : > { %v2432_v27 = vmin.f32 %v2429_v5, %v4073_v23  ;;  %v4081_v6 = vadd.f32 %v1341_v3, %v1184_v52  ;;  %v1186_v38 = vadd.f32 %v1185_v46, %v1010_v25  ;;  %v1035_v52 = vadd.f32 %v3933_v60, %v855_v48 }
 0x167   : > { %v1343_v57 = vpop.f32.mrf.mxu1  ;;  %v1190_v7 = vpop.f32.mrf.mxu0  ;;  %v1037_v60 = vadd.f32 %v3940_v24, %v857_v47  ;;  %v1046_v48 = vadd.f32 %v3954_v31, %v865_v50 }
 0x168   : > { %v2434_v20 = vmin.f32 %v2431_v28, %v4081_v6  ;;  %v4087_v29 = vadd.f32 %v1343_v57, %v1186_v38  ;;  %v1191_v43 = vadd.f32 %v1190_v7, %v1017_v10  ;;  %v863_v10 = vadd.f32 %v3942_v54, %v3790_v51 }
 0x169   : > { %v1348_v5 = vpop.f32.mrf.mxu1  ;;  %v1192_v35 = vpop.f32.mrf.mxu0 }
 0x16a   : > { %v2435_v37 = vmin.f32 %v2432_v27, %v4087_v29  ;;  %v4095_v53 = vadd.f32 %v1348_v5, %v1191_v43  ;;  %v1193_v13 = vadd.f32 %v1192_v35, %v1019_v22  ;;  %v1044_v7 = vadd.f32 %v3947_v16, %v863_v10 }
 0x16b   : > { %v1350_v34 = vpop.f32.mrf.mxu1  ;;  %v1197_v40 = vpop.f32.mrf.mxu0  ;;  %v871_v22 = vadd.f32 %v3956_v45, %v3800_v55  ;;  %v873_v16 = vadd.f32 %v3964_v63, %v3805_v49  ;;  %v881_v63 = vadd.f32 %v3978_v8, %v3815_v19 }
 0x16c   : > { %v2437_v28 = vmin.f32 %v2434_v20, %v4095_v53  ;;  %v4101_v44 = vadd.f32 %v1350_v34, %v1193_v13  ;;  %v1198_v30 = vadd.f32 %v1197_v40, %v1026_v32 }
 0x16d   : > { %v1355_v18 = vpop.f32.mrf.mxu1  ;;  %v1199_v3 = vpop.f32.mrf.mxu0  ;;  %v1053_v13 = vadd.f32 %v3961_v36, %v871_v22  ;;  %v1055_v36 = vadd.f32 %v3968_v41, %v873_v16 }
 0x16e   : > { %v2438_v46 = vmin.f32 %v2435_v37, %v4101_v44  ;;  %v4109_v27 = vadd.f32 %v1355_v18, %v1198_v30  ;;  %v1200_v26 = vadd.f32 %v1199_v3, %v1028_v4  ;;  %v879_v4 = vadd.f32 %v3970_v62, %v3810_v2  ;;  %v4410_v18 = vld [vmem:[#allocation8_spill] sm:$0xff] }
 0x16f   : > { %v1357_v38 = vpop.f32.mrf.mxu1  ;;  %v1204_v1 = vpop.f32.mrf.mxu0 }
 0x170   : > { %v2440_v57 = vmin.f32 %v2437_v28, %v4109_v27  ;;  %v4115_v51 = vadd.f32 %v1357_v38, %v1200_v26  ;;  %v1205_v54 = vadd.f32 %v1204_v1, %v1035_v52  ;;  %v1062_v3 = vadd.f32 %v4410_v18, %v879_v4  ;;  %v4412_v26 = vld [vmem:[#allocation10_spill] sm:$0xff] }
 0x171   : > { %v1362_v20 = vpop.f32.mrf.mxu1  ;;  %v1206_v43 = vpop.f32.mrf.mxu0 }
 0x172   : > { %v2441_v11 = vmin.f32 %v2438_v46, %v4115_v51  ;;  %v4123_v61 = vadd.f32 %v1362_v20, %v1205_v54  ;;  %v1207_v24 = vadd.f32 %v1206_v43, %v1037_v60  ;;  %v4411_v46 = vld [vmem:[#allocation6_spill] sm:$0xff]  ;;  %v4415_v20 = vld [vmem:[#allocation7_spill] sm:$0xff]  ;;  %v4416_v43 = vld [vmem:[#allocation12_spill] sm:$0xff] }
 0x173   : > { %v1364_v5 = vpop.f32.mrf.mxu1  ;;  %v1211_v35 = vpop.f32.mrf.mxu0  ;;  %v887_v50 = vadd.f32 %v4412_v26, %v4411_v46 }
 0x174   : > { %4406 = vst [vmem:[#allocation14_spill] sm:$0xff] %v4123_v61  ;;  %v2443_v37 = vmin.f32 %v2440_v57, %v4123_v61  ;;  %v4129_v55 = vadd.f32 %v1364_v5, %v1207_v24  ;;  %v1212_v45 = vadd.f32 %v1211_v35, %v1044_v7  ;;  %v4414_v57 = vld [vmem:[#allocation9_spill] sm:$0xff]  ;;  %v4418_v35 = vld [vmem:[#allocation11_spill] sm:$0xff] }
 0x175   : > { %v1369_v34 = vpop.f32.mrf.mxu1  ;;  %v1213_v40 = vpop.f32.mrf.mxu0  ;;  %v1064_v54 = vadd.f32 %v4414_v57, %v881_v63  ;;  %v1071_v16 = vadd.f32 %v4418_v35, %v887_v50  ;;  %v4420_v63 = vld [vmem:[#allocation13_spill] sm:$0xff] }
 0x176   : > { %4407 = vst [vmem:[#allocation15_spill] sm:$0xff] %v4129_v55  ;;  %v2444_v47 = vmin.f32 %v2441_v11, %v4129_v55  ;;  %v4137_v28 = vadd.f32 %v1369_v34, %v1212_v45  ;;  %v1214_v49 = vadd.f32 %v1213_v40, %v1046_v48  ;;  %v889_v11 = vadd.f32 %v4416_v43, %v4415_v20 }
 0x177   : > { %v1371_v30 = vpop.f32.mrf.mxu1  ;;  %v1218_v52 = vpop.f32.mrf.mxu0 }
 0x178   : > { %4408 = vst [vmem:[#allocation16_spill] sm:$0xff] %v4137_v28  ;;  %v2446_v10 = vmin.f32 %v2443_v37, %v4137_v28  ;;  %v4143_v2 = vadd.f32 %v1371_v30, %v1214_v49  ;;  %v1219_v62 = vadd.f32 %v1218_v52, %v1053_v13  ;;  %v1073_v30 = vadd.f32 %v4420_v63, %v889_v11 }
 0x179   : > { %v1376_v38 = vpop.f32.mrf.mxu1  ;;  %v1220_v1 = vpop.f32.mrf.mxu0 }
 0x17a   : > { %4409 = vst [vmem:[#allocation17_spill] sm:$0xff] %v4143_v2  ;;  %v2447_v8 = vmin.f32 %v2444_v47, %v4143_v2  ;;  %v4151_v60 = vadd.f32 %v1376_v38, %v1219_v62  ;;  %v1221_v41 = vadd.f32 %v1220_v1, %v1055_v36 }
 0x17b   : > { %v1378_v7 = vpop.f32.mrf.mxu1  ;;  %v1225_v22 = vpop.f32.mrf.mxu0 }
 0x17c   : > { %4413 = vst [vmem:[#allocation8_spill] sm:$0xff] %v4151_v60  ;;  %v2449_v24 = vmin.f32 %v2446_v10, %v4151_v60  ;;  %v4157_v48 = vadd.f32 %v1378_v7, %v1221_v41  ;;  %v1226_v5 = vadd.f32 %v1225_v22, %v1062_v3 }
 0x17d   : > { %v1383_v37 = vpop.f32.mrf.mxu1  ;;  %v1227_v45 = vpop.f32.mrf.mxu0 }
 0x17e   : > { %4417 = vst [vmem:[#allocation6_spill] sm:$0xff] %v4157_v48  ;;  %v2450_v4 = vmin.f32 %v2447_v8, %v4157_v48  ;;  %v4164_v34 = vadd.f32 %v1383_v37, %v1226_v5  ;;  %v1228_v40 = vadd.f32 %v1227_v45, %v1064_v54 }
 0x17f   : > { %v1385_v47 = vpop.f32.mrf.mxu1  ;;  %v1232_v49 = vpop.f32.mrf.mxu0 }
 0x180   : > { %4419 = vst [vmem:[#allocation10_spill] sm:$0xff] %v4164_v34  ;;  %v2452_v52 = vmin.f32 %v2449_v24, %v4164_v34  ;;  %v4170_v36 = vadd.f32 %v1385_v47, %v1228_v40  ;;  %v1233_v10 = vadd.f32 %v1232_v49, %v1071_v16 }
 0x181   : > { %v1390_v62 = vpop.f32.mrf.mxu1  ;;  %v1234_v18 = vpop.f32.mrf.mxu0 }
 0x182   : > { %4421 = vst [vmem:[#allocation9_spill] sm:$0xff] %v4170_v36  ;;  %v2453_v46 = vmin.f32 %v2450_v4, %v4170_v36  ;;  %v4175_v26 = vadd.f32 %v1390_v62, %v1233_v10  ;;  %v1235_v50 = vadd.f32 %v1234_v18, %v1073_v30 }
 0x183   : > { %v1392_v38 = vpop.f32.mrf.mxu1  ;;  %v1467_v1 = vpop.f32.mrf.mxu0 }
 0x184   : > { %4422 = vst [vmem:[#allocation7_spill] sm:$0xff] %v4175_v26  ;;  %v2455_v8 = vmin.f32 %v2452_v52, %v4175_v26  ;;  %v4178_v41 = vadd.f32 %v1392_v38, %v1235_v50 }
 0x185   : > { %v1663_v57 = vpop.f32.mrf.mxu1  ;;  %v2784_v54 = vpop.f32.mrf.mxu0 }
 0x186   : > { %4423 = vst [vmem:[#allocation12_spill] sm:$0xff] %v4178_v41  ;;  %2458 = vst [vmem:[%s4180_s10] sm:$0xff] %v2455_v8  ;;  %v2456_v22 = vmin.f32 %v2453_v46, %v4178_v41  ;;  %v4186_v20 = vadd.f32 %v1663_v57, %v1467_v1 }
 0x187   : > { %v2825_v43 = vpop.f32.mrf.mxu1  ;;  %v1477_v11 = vpop.f32.mrf.mxu0 }
 0x188   : > { %2459 = vst [vmem:[%s4180_s10 + $0x8] sm:$0xff] %v2456_v22 }
 0x189   : > { %v1669_v24 = vpop.f32.mrf.mxu1  ;;  %v2787_v5 = vpop.f32.mrf.mxu0 }
 0x18a   : > { %v4189_v35 = vadd.f32 %v1669_v24, %v1477_v11 }
 0x18b   : > { %v2828_v16 = vpop.f32.mrf.mxu1  ;;  %v1487_v37 = vpop.f32.mrf.mxu0 }
 0x18d   : > { %v1675_v45 = vpop.f32.mrf.mxu1  ;;  %v2790_v4 = vpop.f32.mrf.mxu0 }
 0x18e   : > { %v4191_v40 = vadd.f32 %v1675_v45, %v1487_v37 }
 0x18f   : > { %v2831_v47 = vpop.f32.mrf.mxu1  ;;  %v1497_v49 = vpop.f32.mrf.mxu0 }
 0x191   : > { %v1681_v63 = vpop.f32.mrf.mxu1  ;;  %v2793_v30 = vpop.f32.mrf.mxu0 }
 0x192   : > { %v4193_v52 = vadd.f32 %v1681_v63, %v1497_v49 }
 0x193   : > { %v2834_v10 = vpop.f32.mrf.mxu1  ;;  %v1507_v62 = vpop.f32.mrf.mxu0 }
 0x195   : > { %v1687_v18 = vpop.f32.mrf.mxu1  ;;  %v2796_v46 = vpop.f32.mrf.mxu0 }
 0x196   : > { %v4195_v50 = vadd.f32 %v1687_v18, %v1507_v62 }
 0x197   : > { %v2837_v38 = vpop.f32.mrf.mxu1  ;;  %v1517_v1 = vpop.f32.mrf.mxu0 }
 0x199   : > { %v1693_v8 = vpop.f32.mrf.mxu1  ;;  %v2799_v57 = vpop.f32.mrf.mxu0 }
 0x19a   : > { %v4197_v54 = vadd.f32 %v1693_v8, %v1517_v1 }
 0x19b   : > { %v2840_v22 = vpop.f32.mrf.mxu1  ;;  %v1527_v43 = vpop.f32.mrf.mxu0 }
 0x19d   : > { %v1699_v11 = vpop.f32.mrf.mxu1  ;;  %v2802_v24 = vpop.f32.mrf.mxu0 }
 0x19e   : > { %v4199_v5 = vadd.f32 %v1699_v11, %v1527_v43 }
 0x19f   : > { %v2843_v16 = vpop.f32.mrf.mxu1  ;;  %v1537_v37 = vpop.f32.mrf.mxu0 }
 0x1a1   : > { %v1705_v45 = vpop.f32.mrf.mxu1  ;;  %v2805_v4 = vpop.f32.mrf.mxu0 }
 0x1a2   : > { %v4201_v47 = vadd.f32 %v1705_v45, %v1537_v37 }
 0x1a3   : > { %v2846_v49 = vpop.f32.mrf.mxu1  ;;  %v1547_v63 = vpop.f32.mrf.mxu0 }
 0x1a5   : > { %v1711_v30 = vpop.f32.mrf.mxu1  ;;  %v2808_v10 = vpop.f32.mrf.mxu0 }
 0x1a6   : > { %v4203_v62 = vadd.f32 %v1711_v30, %v1547_v63 }
 0x1a7   : > { %v2849_v18 = vpop.f32.mrf.mxu1  ;;  %v1557_v46 = vpop.f32.mrf.mxu0 }
 0x1a9   : > { %v1717_v38 = vpop.f32.mrf.mxu1  ;;  %v2811_v1 = vpop.f32.mrf.mxu0 }
 0x1aa   : > { %v4205_v8 = vadd.f32 %v1717_v38, %v1557_v46 }
 0x1ab   : > { %v2852_v57 = vpop.f32.mrf.mxu1  ;;  %v1567_v22 = vpop.f32.mrf.mxu0 }
 0x1ad   : > { %v1723_v43 = vpop.f32.mrf.mxu1  ;;  %v2814_v11 = vpop.f32.mrf.mxu0 }
 0x1ae   : > { %v4207_v24 = vadd.f32 %v1723_v43, %v1567_v22 }
 0x1af   : > { %v2855_v16 = vpop.f32.mrf.mxu1  ;;  %v1577_v37 = vpop.f32.mrf.mxu0 }
 0x1b1   : > { %v1729_v45 = vpop.f32.mrf.mxu1  ;;  %v2817_v4 = vpop.f32.mrf.mxu0 }
 0x1b2   : > { %v4209_v49 = vadd.f32 %v1729_v45, %v1577_v37 }
 0x1b3   : > { %v2858_v63 = vpop.f32.mrf.mxu1  ;;  %v1587_v30 = vpop.f32.mrf.mxu0 }
 0x1b4   : > { %4424 = vst [vmem:[#allocation11_spill] sm:$0xff] %v4209_v49 }
 0x1b5   : > { %v1735_v10 = vpop.f32.mrf.mxu1  ;;  %v2820_v18 = vpop.f32.mrf.mxu0 }
 0x1b6   : > { %v4211_v7 = vadd.f32 %v1735_v10, %v1587_v30 }
 0x1b7   : > { %v2861_v46 = vpop.f32.mrf.mxu1  ;;  %v1809_v38 = vpop.f32.mrf.mxu0 }
 0x1b8   : > { %4425 = vst [vmem:[#allocation13_spill] sm:$0xff] %v4211_v7 }
 0x1b9   : > { %v1967_v1 = vpop.f32.mrf.mxu1  ;;  %v2866_v57 = vpop.f32.mrf.mxu0 }
 0x1bb   : > { %v2907_v3 = vpop.f32.mrf.mxu1  ;;  %v1816_v11 = vpop.f32.mrf.mxu0 }
 0x1bc   : > { %v1817_v28 = vadd.f32 %v1816_v11, %v4189_v35 }
 0x1bd   : > { %v1975_v22 = vpop.f32.mrf.mxu1  ;;  %v2869_v43 = vpop.f32.mrf.mxu0 }
 0x1bf   : > { %v2910_v16 = vpop.f32.mrf.mxu1  ;;  %v1823_v13 = vpop.f32.mrf.mxu0 }
 0x1c1   : > { %v1983_v19 = vpop.f32.mrf.mxu1  ;;  %v2872_v4 = vpop.f32.mrf.mxu0 }
 0x1c3   : > { %v2913_v37 = vpop.f32.mrf.mxu1  ;;  %v1830_v45 = vpop.f32.mrf.mxu0 }
 0x1c4   : > { %v1831_v35 = vadd.f32 %v1830_v45, %v4193_v52 }
 0x1c5   : > { %v4213_v63 = vpop.f32.mrf.mxu1  ;;  %v2875_v31 = vpop.f32.mrf.mxu0 }
 0x1c7   : > { %v2916_v18 = vpop.f32.mrf.mxu1  ;;  %v4215_v30 = vpop.f32.mrf.mxu0 }
 0x1c9   : > { %v4217_v10 = vpop.f32.mrf.mxu1  ;;  %v2878_v46 = vpop.f32.mrf.mxu0 }
 0x1cb   : > { %v2919_v57 = vpop.f32.mrf.mxu1  ;;  %v4219_v3 = vpop.f32.mrf.mxu0 }
 0x1cd   : > { %v4221_v32 = vpop.f32.mrf.mxu1  ;;  %v2881_v43 = vpop.f32.mrf.mxu0 }
 0x1cf   : > { %v2922_v16 = vpop.f32.mrf.mxu1  ;;  %v4223_v15 = vpop.f32.mrf.mxu0 }
 0x1d1   : > { %v4225_v4 = vpop.f32.mrf.mxu1  ;;  %v2884_v37 = vpop.f32.mrf.mxu0 }
 0x1d3   : > { %v2925_v25 = vpop.f32.mrf.mxu1  ;;  %v4227_v31 = vpop.f32.mrf.mxu0 }
 0x1d5   : > { %v4229_v18 = vpop.f32.mrf.mxu1  ;;  %v2887_v39 = vpop.f32.mrf.mxu0 }
 0x1d7   : > { %v2928_v17 = vpop.f32.mrf.mxu1  ;;  %v4231_v46 = vpop.f32.mrf.mxu0 }
 0x1d9   : > { %v4233_v57 = vpop.f32.mrf.mxu1  ;;  %v2890_v9 = vpop.f32.mrf.mxu0 }
 0x1da   : > { %v1810_v9 = vadd.f32 %v1809_v38, %v4186_v20 }
 0x1db   : > { %v2931_v41 = vpop.f32.mrf.mxu1  ;;  %v4235_v43 = vpop.f32.mrf.mxu0 }
 0x1dd   : > { %v4237_v16 = vpop.f32.mrf.mxu1  ;;  %v2893_v26 = vpop.f32.mrf.mxu0 }
 0x1df   : > { %v2934_v36 = vpop.f32.mrf.mxu1  ;;  %v4239_v37 = vpop.f32.mrf.mxu0 }
 0x1e0   : > { %v1968_v36 = vadd.f32 %v1967_v1, %v1810_v9 }
 0x1e1   : > { %v4241_v25 = vpop.f32.mrf.mxu1  ;;  %v2896_v34 = vpop.f32.mrf.mxu0 }
 0x1e2   : > { %4426 = vst [vmem:[#allocation18_spill] sm:$0xff] %v4241_v25 }
 0x1e3   : > { %v2937_v48 = vpop.f32.mrf.mxu1  ;;  %v4243_v39 = vpop.f32.mrf.mxu0 }
 0x1e4   : > { %4427 = vst [vmem:[#allocation19_spill] sm:$0xff] %v4243_v39  ;;  %v1976_v39 = vadd.f32 %v1975_v22, %v1817_v28 }
 0x1e5   : > { %v4245_v17 = vpop.f32.mrf.mxu1  ;;  %v2899_v60 = vpop.f32.mrf.mxu0 }
 0x1e6   : > { %4428 = vst [vmem:[#allocation20_spill] sm:$0xff] %v4245_v17  ;;  %v1824_v17 = vadd.f32 %v1823_v13, %v4191_v40 }
 0x1e7   : > { %v2940_v41 = vpop.f32.mrf.mxu1  ;;  %v4248_v7 = vpop.f32.mrf.mxu0 }
 0x1e8   : > { %v4430_v41 = vmin.f32 %v4007_v59, %v4009_v42  ;;  %v1984_v9 = vadd.f32 %v1983_v19, %v1824_v17  ;;  %v1992_v42 = vadd.f32 %v4213_v63, %v1831_v35  ;;  %v1838_v59 = vadd.f32 %v4215_v30, %v4195_v50 }
 0x1e9   : > { %v4250_v2 = vpop.f32.mrf.mxu1  ;;  %v2902_v26 = vpop.f32.mrf.mxu0  ;;  %v4432_v17 = vmin.f32 %v4035_v21, %v4042_v33  ;;  %v1845_v63 = vadd.f32 %v4219_v3, %v4197_v54 }
 0x1ea   : > { %4429 = vst [vmem:[#allocation21_spill] sm:$0xff] %v4250_v2 }
 0x1eb   : > { %v2943_v49 = vpop.f32.mrf.mxu1  ;;  %v2137_v25 = vpop.f32.mrf.mxu0  ;;  %v2008_v33 = vadd.f32 %v4221_v32, %v1845_v63  ;;  %v1859_v32 = vadd.f32 %v4227_v31, %v4201_v47 }
 0x1ec   : > { %v2138_v34 = vadd.f32 %v2137_v25, %v1968_v36 }
 0x1ed   : > { %v2281_v48 = vpop.f32.mrf.mxu1  ;;  %v2948_v55 = vpop.f32.mrf.mxu0 }
 0x1ee   : > { %v2282_v60 = vadd.f32 %v2281_v48, %v2138_v34 }
 0x1ef   : > { %v2989_v61 = vpop.f32.mrf.mxu1  ;;  %v2143_v20 = vpop.f32.mrf.mxu0 }
 0x1f0   : > { %v2144_v38 = vadd.f32 %v2143_v20, %v1976_v39  ;;  %v2396_v2 = vmin.f32 %v4430_v41, %v2282_v60  ;;  %v4431_v61 = vmin.f32 %v4015_v14, %v4025_v58  ;;  %v2000_v58 = vadd.f32 %v4217_v10, %v1838_v59 }
 0x1f1   : > { %v2287_v26 = vpop.f32.mrf.mxu1  ;;  %v2951_v1 = vpop.f32.mrf.mxu0  ;;  %v1852_v10 = vadd.f32 %v4223_v15, %v4199_v5 }
 0x1f2   : > { %v2288_v49 = vadd.f32 %v2287_v26, %v2144_v38  ;;  %2477 = vmin.xlane.f32.xlu0 %v2396_v2  ;;  %v4433_v38 = vmin.f32 %v4049_v0, %v4057_v56 }
 0x1f3   : > { %v2992_v11 = vpop.f32.mrf.mxu1  ;;  %v2149_v55 = vpop.f32.mrf.mxu0  ;;  %v2016_v56 = vadd.f32 %v4225_v4, %v1852_v10  ;;  %v1866_v4 = vadd.f32 %v4231_v46, %v4203_v62 }
 0x1f4   : > { %v2424_v28 = vmin.f32 %v2282_v60, %v2288_v49  ;;  %v2150_v22 = vadd.f32 %v2149_v55, %v1984_v9  ;;  %v2397_v13 = vmin.f32 %v4431_v61, %v2288_v49  ;;  %v4434_v49 = vmin.f32 %v4066_v12, %v4073_v23 }
 0x1f5   : > { %v2293_v40 = vpop.f32.mrf.mxu1  ;;  %v2954_v25 = vpop.f32.mrf.mxu0  ;;  %v2024_v23 = vadd.f32 %v4229_v18, %v1859_v32  ;;  %v1873_v18 = vadd.f32 %v4235_v43, %v4205_v8  ;;  %v4448_v32 = vld [vmem:[#allocation13_spill] sm:$0xff] }
 0x1f6   : > { %v2294_v19 = vadd.f32 %v2293_v40, %v2150_v22  ;;  %2479 = vmin.xlane.f32.xlu0 %v2397_v13  ;;  %v4435_v13 = vmin.f32 %v4081_v6, %v4087_v29  ;;  %v2032_v29 = vadd.f32 %v4233_v57, %v1866_v4  ;;  %v1880_v57 = vadd.f32 %v4239_v37, %v4207_v24 }
 0x1f7   : > { %v2995_v52 = vpop.f32.mrf.mxu1  ;;  %v2155_v45 = vpop.f32.mrf.mxu0 }
 0x1f8   : > { %v2427_v2 = vmin.f32 %v2424_v28, %v2294_v19  ;;  %v2156_v39 = vadd.f32 %v2155_v45, %v1992_v42  ;;  %v2398_v36 = vmin.f32 %v4432_v17, %v2294_v19  ;;  %v4436_v52 = vmin.f32 %v4095_v53, %v4101_v44 }
 0x1f9   : > { %v2299_v34 = vpop.f32.mrf.mxu1  ;;  %v2957_v14 = vpop.f32.mrf.mxu0  ;;  %v2040_v44 = vadd.f32 %v4237_v16, %v1873_v18 }
 0x1fa   : > { %v2300_v48 = vadd.f32 %v2299_v34, %v2156_v39  ;;  %2481 = vmin.xlane.f32.xlu1 %v2398_v36  ;;  %v4437_v34 = vmin.f32 %v4109_v27, %v4115_v51  ;;  %v4441_v51 = vld [vmem:[#allocation18_spill] sm:$0xff] }
 0x1fb   : > { %v2998_v50 = vpop.f32.mrf.mxu1  ;;  %v2161_v30 = vpop.f32.mrf.mxu0 }
 0x1fc   : > { %v2430_v60 = vmin.f32 %v2427_v2, %v2300_v48  ;;  %v2162_v20 = vadd.f32 %v2161_v30, %v2000_v58  ;;  %v2399_v41 = vmin.f32 %v4433_v38, %v2300_v48  ;;  %v4438_v30 = vld [vmem:[#allocation14_spill] sm:$0xff] }
 0x1fd   : > { %v2305_v26 = vpop.f32.mrf.mxu1  ;;  %v2960_v21 = vpop.f32.mrf.mxu0 }
 0x1fe   : > { %v2306_v1 = vadd.f32 %v2305_v26, %v2162_v20  ;;  %2483 = vmin.xlane.f32.xlu1 %v2399_v41  ;;  %v2048_v26 = vadd.f32 %v4441_v51, %v1880_v57  ;;  %v4442_v21 = vld [vmem:[#allocation11_spill] sm:$0xff] }
 0x1ff   : > { %v3001_v54 = vpop.f32.mrf.mxu1  ;;  %v2167_v3 = vpop.f32.mrf.mxu0 }
 0x200   : > { %v2433_v9 = vmin.f32 %v2430_v60, %v2306_v1  ;;  %v2168_v35 = vadd.f32 %v2167_v3, %v2008_v33  ;;  %v2400_v11 = vmin.f32 %v4434_v49, %v2306_v1  ;;  %v4439_v60 = vld [vmem:[#allocation15_spill] sm:$0xff]  ;;  %v4444_v3 = vld [vmem:[#allocation16_spill] sm:$0xff] }
 0x201   : > { %v2311_v55 = vpop.f32.mrf.mxu1  ;;  %v2963_v0 = vpop.f32.mrf.mxu0  ;;  %v4440_v20 = vmin.f32 %v4438_v30, %v4439_v60  ;;  %v4443_v33 = vld [vmem:[#allocation19_spill] sm:$0xff] }
 0x202   : > { %v2312_v28 = vadd.f32 %v2311_v55, %v2168_v35  ;;  %2485 = vmin.xlane.f32.xlu0 %v2400_v11  ;;  %v1887_v16 = vadd.f32 %v4443_v33, %v4442_v21  ;;  %v4447_v0 = vld [vmem:[#allocation20_spill] sm:$0xff] }
 0x203   : > { %v3004_v15 = vpop.f32.mrf.mxu1  ;;  %v2173_v5 = vpop.f32.mrf.mxu0 }
 0x204   : > { %v2436_v22 = vmin.f32 %v2433_v9, %v2312_v28  ;;  %v2174_v61 = vadd.f32 %v2173_v5, %v2016_v56  ;;  %v2401_v40 = vmin.f32 %v4435_v13, %v2312_v28  ;;  %v4445_v9 = vld [vmem:[#allocation17_spill] sm:$0xff]  ;;  %v2056_v56 = vadd.f32 %v4447_v0, %v1887_v16 }
 0x205   : > { %v2317_v25 = vpop.f32.mrf.mxu1  ;;  %v2966_v12 = vpop.f32.mrf.mxu0  ;;  %v4446_v35 = vmin.f32 %v4444_v3, %v4445_v9  ;;  %v1894_v28 = vadd.f32 %v4248_v7, %v4448_v32 }
 0x206   : > { %v2318_v42 = vadd.f32 %v2317_v25, %v2174_v61  ;;  %2487 = vmin.xlane.f32.xlu1 %v2401_v40  ;;  %v4449_v40 = vld [vmem:[#allocation8_spill] sm:$0xff]  ;;  %v4450_v25 = vld [vmem:[#allocation6_spill] sm:$0xff] }
 0x207   : > { %v3007_v47 = vpop.f32.mrf.mxu1  ;;  %v2179_v31 = vpop.f32.mrf.mxu0  ;;  %v4451_v12 = vmin.f32 %v4449_v40, %v4450_v25 }
 0x208   : > { %v2439_v59 = vmin.f32 %v2436_v22, %v2318_v42  ;;  %v2180_v19 = vadd.f32 %v2179_v31, %v2024_v23  ;;  %v2402_v45 = vmin.f32 %v4436_v52, %v2318_v42  ;;  %v4452_v47 = vld [vmem:[#allocation21_spill] sm:$0xff] }
 0x209   : > { %v2323_v2 = vpop.f32.mrf.mxu1  ;;  %v2969_v6 = vpop.f32.mrf.mxu0  ;;  %v2064_v31 = vadd.f32 %v4452_v47, %v1894_v28 }
 0x20a   : > { %v2324_v39 = vadd.f32 %v2323_v2, %v2180_v19  ;;  %2489 = vmin.xlane.f32.xlu0 %v2402_v45  ;;  %v4453_v2 = vld [vmem:[#allocation10_spill] sm:$0xff]  ;;  %v4454_v6 = vld [vmem:[#allocation9_spill] sm:$0xff] }
 0x20b   : > { %v3010_v62 = vpop.f32.mrf.mxu1  ;;  %v2185_v46 = vpop.f32.mrf.mxu0 }
 0x20c   : > { %v2442_v17 = vmin.f32 %v2439_v59, %v2324_v39  ;;  %v2186_v36 = vadd.f32 %v2185_v46, %v2032_v29  ;;  %v2403_v14 = vmin.f32 %v4437_v34, %v2324_v39  ;;  %v4455_v29 = vmin.f32 %v4453_v2, %v4454_v6  ;;  %v4456_v34 = vld [vmem:[#allocation7_spill] sm:$0xff] }
 0x20d   : > { %v2329_v58 = vpop.f32.mrf.mxu1  ;;  %v2972_v53 = vpop.f32.mrf.mxu0 }
 0x20e   : > { %v2330_v63 = vadd.f32 %v2329_v58, %v2186_v36  ;;  %2491 = vmin.xlane.f32.xlu1 %v2403_v14  ;;  %v4457_v14 = vld [vmem:[#allocation12_spill] sm:$0xff] }
 0x20f   : > { %v3013_v8 = vpop.f32.mrf.mxu1  ;;  %v2191_v43 = vpop.f32.mrf.mxu0  ;;  %v4458_v58 = vmin.f32 %v4456_v34, %v4457_v14 }
 0x210   : > { %v2445_v48 = vmin.f32 %v2442_v17, %v2330_v63  ;;  %v2192_v50 = vadd.f32 %v2191_v43, %v2040_v44  ;;  %v2404_v38 = vmin.f32 %v4440_v20, %v2330_v63 }
 0x211   : > { %v2335_v41 = vpop.f32.mrf.mxu1  ;;  %v2975_v27 = vpop.f32.mrf.mxu0 }
 0x212   : > { %v2336_v10 = vadd.f32 %v2335_v41, %v2192_v50  ;;  %2493 = vmin.xlane.f32.xlu0 %v2404_v38 }
 0x213   : > { %v3016_v24 = vpop.f32.mrf.mxu1  ;;  %v2197_v37 = vpop.f32.mrf.mxu0 }
 0x214   : > { %v2448_v1 = vmin.f32 %v2445_v48, %v2336_v10  ;;  %v2198_v54 = vadd.f32 %v2197_v37, %v2048_v26  ;;  %v2405_v49 = vmin.f32 %v4446_v35, %v2336_v10 }
 0x215   : > { %v2341_v11 = vpop.f32.mrf.mxu1  ;;  %v2978_v55 = vpop.f32.mrf.mxu0 }
 0x216   : > { %v2342_v15 = vadd.f32 %v2341_v11, %v2198_v54  ;;  %2495 = vmin.xlane.f32.xlu1 %v2405_v49 }
 0x217   : > { %v3019_v5 = vpop.f32.mrf.mxu1  ;;  %v2203_v22 = vpop.f32.mrf.mxu0 }
 0x218   : > { %v2451_v61 = vmin.f32 %v2448_v1, %v2342_v15  ;;  %v2204_v13 = vadd.f32 %v2203_v22, %v2056_v56  ;;  %v2406_v23 = vmin.f32 %v4451_v12, %v2342_v15 }
 0x219   : > { %v2347_v4 = vpop.f32.mrf.mxu1  ;;  %v2981_v42 = vpop.f32.mrf.mxu0 }
 0x21a   : > { %v2348_v59 = vadd.f32 %v2347_v4, %v2204_v13  ;;  %2497 = vmin.xlane.f32.xlu0 %v2406_v23 }
 0x21b   : > { %v3022_v7 = vpop.f32.mrf.mxu1  ;;  %v2209_v19 = vpop.f32.mrf.mxu0 }
 0x21c   : > { %v2454_v52 = vmin.f32 %v2451_v61, %v2348_v59  ;;  %v2210_v45 = vadd.f32 %v2209_v19, %v2064_v31  ;;  %v2407_v18 = vmin.f32 %v4455_v29, %v2348_v59 }
 0x21d   : > { %v2353_v39 = vpop.f32.mrf.mxu1  ;;  %v2984_v62 = vpop.f32.mrf.mxu0 }
 0x21e   : > { %v2354_v46 = vadd.f32 %v2353_v39, %v2210_v45  ;;  %2499 = vmin.xlane.f32.xlu1 %v2407_v18 }
 0x21f   : > { %v3025_v17 = vpop.f32.mrf.mxu1 }
 0x220   : > { %v2457_v36 = vmin.f32 %v2454_v52, %v2354_v46  ;;  %v2408_v53 = vmin.f32 %v4458_v58, %v2354_v46 }
 0x222   : > { %2460 = vst [vmem:[%s4180_s10 + $0x10] sm:$0xff] %v2457_v36  ;;  %2501 = vmin.xlane.f32.xlu0 %v2408_v53 }
 0x223   : > { %3100 = shalt.err (!%p3097_p5)
}
 0x224   : > { %s3101_s15 = scalar_lea.hbm %s2547_s23, 384  ;;  %s3105_s8 = scalar_lea.hbm %s4385_s3, 768 }
 0x225   : > { %p3102_p6 = scmp.ne.s32.totalorder %s2547_s23, %s3101_s15  ;;  %p3106_p10 = scmp.lt.s32.totalorder %s2547_s23, %s4385_s3 }
 0x226   : > { %p3107_p11 = scmp.lt.s32.totalorder %s3105_s8, %s3101_s15 }
 0x227   : > { %p3103_p7 = pnand %p3102_p6, %p3228_p4 }
 0x228   : > { %p3108_p12 = por %p3107_p11, %p3106_p10 }
 0x229   : > { %p3104_p9 = pneg %p3103_p7 }
 0x22b   : > { %p3109_p13 = pnand %p3108_p12, %p3104_p9 }
 0x22d   : > { %3112 = shalt.err (!%p3109_p13)
}
 0x22e   : > { %3030 = dma.vmem_to_hbm [thread:$0]  (%p3228_p4), %s2550_s18, 384, %s2547_s23, %s2527_s28   ;;  %vm2503_vm2 = vcmask 7168  }
 0x22f   : > { %s266_s21 = scalar_lea.vmem %s4384_s2, %s3027_s27 }
 0x27b   : > { %v2478_v44 = vpop.xlane.xlu0 %2477 }
 0x27c   : > { %2504 = vst.msk [vmem:[%s266_s21] sm:$0xff] %vm2503_vm2, %v2478_v44 }
 0x27f   : > { %v2480_v57 = vpop.xlane.xlu0 %2479 }
 0x280   : > { %2505 = vst.msk [vmem:[%s266_s21 + $0x8] sm:$0xff] %vm2503_vm2, %v2480_v57 }
 0x283   : > { %v2482_v63 = vpop.xlane.xlu1 %2481 }
 0x284   : > { %2506 = vst.msk [vmem:[%s266_s21 + $0x10] sm:$0xff] %vm2503_vm2, %v2482_v63 }
 0x287   : > { %v2484_v8 = vpop.xlane.xlu1 %2483 }
 0x288   : > { %2507 = vst.msk [vmem:[%s266_s21 + $0x18] sm:$0xff] %vm2503_vm2, %v2484_v8 }
 0x28b   : > { %v2486_v43 = vpop.xlane.xlu0 %2485 }
 0x28c   : > { %2508 = vst.msk [vmem:[%s266_s21 + $0x20] sm:$0xff] %vm2503_vm2, %v2486_v43 }
 0x28f   : > { %v2488_v48 = vpop.xlane.xlu1 %2487 }
 0x290   : > { %2509 = vst.msk [vmem:[%s266_s21 + $0x28] sm:$0xff] %vm2503_vm2, %v2488_v48 }
 0x293   : > { %v2490_v50 = vpop.xlane.xlu0 %2489 }
 0x294   : > { %2510 = vst.msk [vmem:[%s266_s21 + $0x30] sm:$0xff] %vm2503_vm2, %v2490_v50 }
 0x297   : > { %v2492_v30 = vpop.xlane.xlu1 %2491 }
 0x298   : > { %2511 = vst.msk [vmem:[%s266_s21 + $0x38] sm:$0xff] %vm2503_vm2, %v2492_v30 }
 0x29b   : > { %v2494_v60 = vpop.xlane.xlu0 %2493 }
 0x29c   : > { %2512 = vst.msk [vmem:[%s266_s21 + $0x40] sm:$0xff] %vm2503_vm2, %v2494_v60 }
 0x29f   : > { %v2496_v20 = vpop.xlane.xlu1 %2495 }
 0x2a0   : > { %2513 = vst.msk [vmem:[%s266_s21 + $0x48] sm:$0xff] %vm2503_vm2, %v2496_v20 }
 0x2a3   : > { %v2498_v38 = vpop.xlane.xlu0 %2497 }
 0x2a4   : > { %2514 = vst.msk [vmem:[%s266_s21 + $0x50] sm:$0xff] %vm2503_vm2, %v2498_v38 }
 0x2a7   : > { %v2500_v41 = vpop.xlane.xlu1 %2499 }
 0x2a8   : > { %2515 = vst.msk [vmem:[%s266_s21 + $0x58] sm:$0xff] %vm2503_vm2, %v2500_v41 }
 0x2ab   : > { %v2502_v27 = vpop.xlane.xlu0 %2501 }
 0x2ac   : > { %2516 = vst.msk [vmem:[%s266_s21 + $0x60] sm:$0xff] %vm2503_vm2, %v2502_v27 }
 0x2ad PF: > { %p3036_p4 = scmp.ge.s32.totalorder %s3163_s17, 2  ;;  %s2573_s22 = sand.u32 1, %s3143_s12  }
 0x2ae   : > { %s2574_s26 = scalar_lea.sflag [#allocation4], %s2573_s22 }
 0x2af   : > { %p3033_p0 = pnand %p3036_p4, %p3235_p8 }
 0x2b1   : > { %p3034_p1 = pneg %p3033_p0 }
 0x2b3   : > { %3138 = dma.done.wait (%p3034_p1), %s2574_s26, 384  }
 0x2b4   : > { %3140 = vsyncadd (%p3034_p1), %s2574_s26, 4294966912  ;;  %s17_s17 = sadd.s32 1, %s3163_s17   ;;  %s4459_s12 = smov %s3147_s13 }
 0x2b5   : > { %p14_p2 = scmp.ge.s32.totalorder %s17_s17, 4   ;;  %s4460_s13 = smov %s3151_s14 }
 0x2b6   : > { %s4461_s14 = smov %s3241_s25  ;;  %s4462_s15 = smov %s3159_s16 }
 0x2b7   : > { %s4463_s16 = smov %s4465_s20  ;;  %16 = sbr.rel (!%p14_p2) target bundleno = 4 (0x4), region = 86 }
 0x2bc   :  { %2579 = vsyncpa [#allocation4], 1 }
 0x2bd   :  { %2581 = vsyncpa [#allocation4 + $0x1], 1 }

// kernel: tpu_custom_call.1
= control target key start
LH: loop header
LB: loop body
LE: loop exit
PB: predicated region body
PF: predicated region fallthrough
CT: control target
= control target key end

     0   :  { %9 = vsyncpa [#allocation4], 0  ;;  %s1408_s0 = inlined_call_operand.vmem [shape: f32[2,104,8], index: 0, kind: input, shape index: {}]   ;;  %s1409_s1 = inlined_call_operand.vmem [shape: f32[2,8,384], index: 1, kind: input, shape index: {}]   ;;  %s1410_s2 = inlined_call_operand.vmem [shape: f32[2,104,1], index: 2, kind: output, shape index: {0}]   ;;  %s1411_s3 = inlined_call_operand.hbm [shape: f32[2,1,8,384], index: 3, kind: output, shape index: {1}]  }
   0x1   :  { %11 = vsyncpa [#allocation4 + $0x1], 0  ;;  %s1197_s12 = smov 0   ;;  %s1199_s13 = smov 0  }
   0x2   :  { %s1201_s14 = smov 0   ;;  %s1203_s15 = smov 0  }
   0x3   :  { %s1205_s16 = smov 0   ;;  %s1207_s17 = smov 0  }
   0x4 LB: > { %s943_s18 = sadd.s32 4294967295, %s1172_s17   ;;  %s944_s19 = sadd.s32 4294967294, %s1172_s17   ;;  %s1172_s17 = sphi %s1207_s17, %s17_s17   ;;  %s1168_s16 = sphi %s1205_s16, %s1418_s16   ;;  %s1164_s15 = sphi %s1203_s15, %s1417_s15   ;;  %s1160_s14 = sphi %s1201_s14, %s1416_s14   ;;  %s1156_s13 = sphi %s1199_s13, %s1415_s13   ;;  %s1152_s12 = sphi %s1197_s12, %s1414_s12  }
   0x5   : > { %s36_s20 = sadd.s32 1, %s1168_s16  ;;  %s131_s21 = sadd.s32 1, %s1160_s14 }
   0x6   : > { %p38_p0 = scmp.ge.s32.totalorder %s36_s20, 2  ;;  %p141_p1 = scmp.ne.s32.totalorder %s1160_s14, %s1156_s13 }
   0x7   : > { %p142_p2 = scmp.eq.s32.totalorder %s943_s18, 1  ;;  %p147_p3 = scmp.ne.s32.totalorder %s1156_s13, %s1152_s12 }
   0x8   : > { %s1420_s20 = smov (%p38_p0, %s36_s20), 0  ;;  %p148_p5 = scmp.eq.s32.totalorder %s944_s19, 1 }
   0x9   : > { %p1237_p4 = por %p142_p2, %p141_p1  ;;  %s124_s23 = ssub.s32 %s1168_s16, %s1420_s20 }
   0xa   : > { %p947_p6 = scmp.ge.s32.totalorder %s1172_s17, 1  ;;  %p129_p7 = scmp.eq.s32.totalorder %s124_s23, 0 }
   0xb   : > { %p1244_p8 = por %p148_p5, %p147_p3  ;;  %p192_p9 = scmp.lt.s32.totalorder %s1172_s17, 3 }
   0xc   : > { %s1250_s25 = scalar_select %p129_p7, %s1160_s14, %s131_s21  }
   0xd   : > { %p193_p10 = pnand %p947_p6, %p192_p9 }
   0xe   : > { %p239_p11 = scmp.lt.s32.totalorder (!%p193_p10), %s1164_s15, 1  ;;  %s235_s8 = sand.u32 (!%p193_p10), 1, %s1156_s13  }
   0xf   : > { %196 = sbr.rel (%p193_p10) target bundleno = 415 (0x19f), region = 28  ;;  %s1176_s30 = smov (!%p193_p10), [#allocation3]  }
  0x10   : > { %s1035_s9 = smul.u32 (!%p193_p10), 24, %s235_s8 }
  0x11   : > { %s1038_s11 = smul.u32 (!%p193_p10), 384, %s1164_s15 }
  0x12   : > { %s237_s10 = scalar_lea.vmem (!%p193_p10), [#allocation3], %s1035_s9 }
  0x13   : > { %s807_s18 = sshll.u32 (!%p193_p10), %s237_s10, 4  ;;  %s805_s23 = scalar_lea.hbm (!%p193_p10), %s1411_s3, %s1038_s11  ;;  %s808_s18 = int_to_ptr.vmem [resolvable:$true] %s807_s18 }
  0x14   : > { %v1174_v0 = vmov 0.0   ;;  %vm1175_vm0 = vmmov 0   ;;  %s1257_s26 = scalar_select %p239_p11, %s1164_s15, 1  ;;  %vm302_vm1 = vcmask 64512  }
  0x15   : > { %994 = vmatprep.subr.mxu1 %v1174_v0  ;;  %996 = vmatprep.mubr.msk.f32.mxu1 %vm1175_vm0, %v1174_v0  ;;  %s1096_s29 = scalar_lea.vmem %s808_s18, 384 }
  0x16   : > { %406 = vmatprep.mubr.f32.mxu0 %v1174_v0  ;;  %s1036_s27 = smul.u32 104, %s1257_s26  ;;  %p1097_p12 = scmp.ne.s32.totalorder %s808_s18, %s1096_s29 }
  0x17   : > { %s1037_s28 = smul.u32 24, %s1257_s26 }
  0x18   : > { %s1267_s4 = scalar_lea.vmem %s1408_s0, %s1036_s27  ;;  %p1098_p13 = pnand %p1097_p12, %p1237_p4 }
  0x19   : > { %s256_s7 = scalar_lea.vmem %s1409_s1, %s1037_s28  ;;  %v286_v1 = vld [vmem:[%s1267_s4] sm:$0xff]  ;;  %v287_v5 = vld [vmem:[%s1267_s4 + $0x8] sm:$0xff]  ;;  %v288_v6 = vld [vmem:[%s1267_s4 + $0x10] sm:$0xff]  ;;  %s785_s28 = scalar_lea.sflag [#allocation4], %s235_s8 }
  0x1a   : > { %v300_v2 = vld [vmem:[%s256_s7 + $0x8] sm:$0xff]  ;;  %v301_v3 = vld [vmem:[%s256_s7 + $0x10] sm:$0xff]  ;;  %v299_v4 = vld [vmem:[%s256_s7] sm:$0xff]  ;;  %p1099_p0 = pneg %p1098_p13 }
  0x1b   : > { %372 = vmatprep.subr.mxu0 %v300_v2  ;;  %995 = vmatpush3.msra.mxu1 %v301_v3  ;;  %v289_v7 = vld [vmem:[%s1267_s4 + $0x18] sm:$0xff]  ;;  %v290_v8 = vld [vmem:[%s1267_s4 + $0x20] sm:$0xff]  ;;  %v291_v9 = vld [vmem:[%s1267_s4 + $0x28] sm:$0xff] }
  0x1c   : > { %373 = vmatpush1.msra.mxu0 %v299_v4  ;;  %997 = vmatmul.mubr.msk.f32.vlgmr.msra.gmra.mxu1 %vm302_vm1, %v286_v1  ;;  %v292_v10 = vld [vmem:[%s1267_s4 + $0x30] sm:$0xff]  ;;  %v293_v11 = vld [vmem:[%s1267_s4 + $0x38] sm:$0xff]  ;;  %v294_v12 = vld [vmem:[%s1267_s4 + $0x40] sm:$0xff] }
  0x1d   : > { %951 = vmatmul.mubr.msk.f32.vlgmr.msra.gmra.mxu0 %vm302_vm1, %v286_v1  ;;  %999 = vmatprep.mubr.msk.f32.mxu1 %vm1175_vm0, %v1174_v0  ;;  %v295_v13 = vld [vmem:[%s1267_s4 + $0x48] sm:$0xff]  ;;  %v296_v14 = vld [vmem:[%s1267_s4 + $0x50] sm:$0xff]  ;;  %v297_v15 = vld [vmem:[%s1267_s4 + $0x58] sm:$0xff] }
  0x1e   : > { %412 = vmatprep.mubr.f32.mxu0 %v1174_v0  ;;  %v298_v16 = vld [vmem:[%s1267_s4 + $0x60] sm:$0xff]  ;;  %s1100_s4 = sshll.u32 %s1176_s30, 4  ;;  %s1101_s4 = int_to_ptr.vmem [resolvable:$false] %s1100_s4 }
  0x1f   : > { %s1102_s5 = scalar_lea.vmem %s1101_s4, 768  ;;  %p1103_p1 = scmp.lt.s32.totalorder %s808_s18, %s1101_s4 }
  0x20   : > { %1000 = vmatmul.mubr.msk.f32.gmra.mxu1 %vm302_vm1, %v287_v5  ;;  %p1104_p2 = scmp.lt.s32.totalorder %s1102_s5, %s1096_s29 }
  0x21   : > { %952 = vmatmul.mubr.msk.f32.gmra.mxu0 %vm302_vm1, %v287_v5  ;;  %1002 = vmatprep.mubr.msk.f32.mxu1 %vm1175_vm0, %v1174_v0 }
  0x22   : > { %418 = vmatprep.mubr.f32.mxu0 %v1174_v0  ;;  %p1105_p3 = por %p1104_p2, %p1103_p1 }
  0x24   : > { %1003 = vmatmul.mubr.msk.f32.gmra.mxu1 %vm302_vm1, %v288_v6  ;;  %p1106_p5 = pnand %p1105_p3, %p1099_p0 }
  0x25   : > { %953 = vmatmul.mubr.msk.f32.gmra.mxu0 %vm302_vm1, %v288_v6  ;;  %1005 = vmatprep.mubr.msk.f32.mxu1 %vm1175_vm0, %v1174_v0 }
  0x26   : > { %424 = vmatprep.mubr.f32.mxu0 %v1174_v0 }
  0x28   : > { %1006 = vmatmul.mubr.msk.f32.gmra.mxu1 %vm302_vm1, %v289_v7 }
  0x29   : > { %954 = vmatmul.mubr.msk.f32.gmra.mxu0 %vm302_vm1, %v289_v7  ;;  %1008 = vmatprep.mubr.msk.f32.mxu1 %vm1175_vm0, %v1174_v0 }
  0x2a   : > { %430 = vmatprep.mubr.f32.mxu0 %v1174_v0 }
  0x2c   : > { %1009 = vmatmul.mubr.msk.f32.gmra.mxu1 %vm302_vm1, %v290_v8 }
  0x2d   : > { %955 = vmatmul.mubr.msk.f32.gmra.mxu0 %vm302_vm1, %v290_v8  ;;  %1011 = vmatprep.mubr.msk.f32.mxu1 %vm1175_vm0, %v1174_v0 }
  0x2e   : > { %436 = vmatprep.mubr.f32.mxu0 %v1174_v0 }
  0x30   : > { %1012 = vmatmul.mubr.msk.f32.gmra.mxu1 %vm302_vm1, %v291_v9 }
  0x31   : > { %956 = vmatmul.mubr.msk.f32.gmra.mxu0 %vm302_vm1, %v291_v9  ;;  %1014 = vmatprep.mubr.msk.f32.mxu1 %vm1175_vm0, %v1174_v0 }
  0x32   : > { %442 = vmatprep.mubr.f32.mxu0 %v1174_v0 }
  0x34   : > { %1015 = vmatmul.mubr.msk.f32.gmra.mxu1 %vm302_vm1, %v292_v10 }
  0x35   : > { %957 = vmatmul.mubr.msk.f32.gmra.mxu0 %vm302_vm1, %v292_v10  ;;  %1017 = vmatprep.mubr.msk.f32.mxu1 %vm1175_vm0, %v1174_v0 }
  0x36   : > { %448 = vmatprep.mubr.f32.mxu0 %v1174_v0 }
  0x38   : > { %1018 = vmatmul.mubr.msk.f32.gmra.mxu1 %vm302_vm1, %v293_v11 }
  0x39   : > { %958 = vmatmul.mubr.msk.f32.gmra.mxu0 %vm302_vm1, %v293_v11  ;;  %1020 = vmatprep.mubr.msk.f32.mxu1 %vm1175_vm0, %v1174_v0 }
  0x3a   : > { %454 = vmatprep.mubr.f32.mxu0 %v1174_v0 }
  0x3c   : > { %1021 = vmatmul.mubr.msk.f32.gmra.mxu1 %vm302_vm1, %v294_v12 }
  0x3d   : > { %959 = vmatmul.mubr.msk.f32.gmra.mxu0 %vm302_vm1, %v294_v12  ;;  %1023 = vmatprep.mubr.msk.f32.mxu1 %vm1175_vm0, %v1174_v0 }
  0x3e   : > { %460 = vmatprep.mubr.f32.mxu0 %v1174_v0 }
  0x40   : > { %1024 = vmatmul.mubr.msk.f32.gmra.mxu1 %vm302_vm1, %v295_v13 }
  0x41   : > { %960 = vmatmul.mubr.msk.f32.gmra.mxu0 %vm302_vm1, %v295_v13  ;;  %1026 = vmatprep.mubr.msk.f32.mxu1 %vm1175_vm0, %v1174_v0 }
  0x42   : > { %466 = vmatprep.mubr.f32.mxu0 %v1174_v0 }
  0x44   : > { %1027 = vmatmul.mubr.msk.f32.gmra.mxu1 %vm302_vm1, %v296_v14 }
  0x45   : > { %961 = vmatmul.mubr.msk.f32.gmra.mxu0 %vm302_vm1, %v296_v14  ;;  %1029 = vmatprep.mubr.msk.f32.mxu1 %vm1175_vm0, %v1174_v0 }
  0x46   : > { %472 = vmatprep.mubr.f32.mxu0 %v1174_v0 }
  0x48   : > { %1030 = vmatmul.mubr.msk.f32.gmra.mxu1 %vm302_vm1, %v297_v15 }
  0x49   : > { %962 = vmatmul.mubr.msk.f32.gmra.mxu0 %vm302_vm1, %v297_v15  ;;  %1032 = vmatprep.mubr.msk.f32.mxu1 %vm1175_vm0, %v1174_v0 }
  0x4a   : > { %478 = vmatprep.mubr.f32.mxu0 %v1174_v0 }
  0x4c   : > { %1033 = vmatmul.mubr.msk.f32.gmra.mxu1 %vm302_vm1, %v298_v16 }
  0x4d   : > { %963 = vmatmul.mubr.msk.f32.gmra.mxu0 %vm302_vm1, %v298_v16 }
  0xdc   : > { %v551_v17 = vpop.f32.mrf.mxu1 }
  0xdd   : > { %v408_v18 = vpop.f32.mrf.mxu0 }
  0xde   : > { %v998_v19 = vpop.f32.mrf.mxu1 }
  0xdf   : > { %v410_v20 = vpop.f32.mrf.mxu0 }
  0xe0   : > { %v641_v21 = vmin.f32 %v408_v18, %v410_v20  ;;  %v556_v22 = vpop.f32.mrf.mxu1 }
  0xe1   : > { %v414_v23 = vpop.f32.mrf.mxu0  ;;  %v682_v53 = vmin.f32 %v551_v17, %v556_v22 }
  0xe2   : > { %v1001_v24 = vpop.f32.mrf.mxu1  ;;  %v654_v25 = vmin.f32 %v641_v21, %v551_v17  ;;  %v680_v58 = vmin.f32 %v408_v18, %v414_v23 }
  0xe3   : > { %v416_v26 = vpop.f32.mrf.mxu0 }
  0xe4   : > { %v642_v27 = vmin.f32 %v414_v23, %v416_v26  ;;  %v561_v28 = vpop.f32.mrf.mxu1  ;;  %735 = vmin.xlane.f32.xlu0 %v654_v25  ;;  %v681_v63 = vmin.f32 %v410_v20, %v416_v26 }
  0xe5   : > { %v420_v29 = vpop.f32.mrf.mxu0  ;;  %v685_v61 = vmin.f32 %v682_v53, %v561_v28 }
  0xe6   : > { %v1004_v30 = vpop.f32.mrf.mxu1  ;;  %v655_v31 = vmin.f32 %v642_v27, %v556_v22  ;;  %v683_v0 = vmin.f32 %v680_v58, %v420_v29 }
  0xe7   : > { %v422_v32 = vpop.f32.mrf.mxu0 }
  0xe8   : > { %v643_v33 = vmin.f32 %v420_v29, %v422_v32  ;;  %v566_v34 = vpop.f32.mrf.mxu1  ;;  %737 = vmin.xlane.f32.xlu0 %v655_v31  ;;  %v684_v5 = vmin.f32 %v681_v63, %v422_v32 }
  0xe9   : > { %v426_v35 = vpop.f32.mrf.mxu0  ;;  %v688_v3 = vmin.f32 %v685_v61, %v566_v34 }
  0xea   : > { %v1007_v36 = vpop.f32.mrf.mxu1  ;;  %v656_v37 = vmin.f32 %v643_v33, %v561_v28  ;;  %v686_v6 = vmin.f32 %v683_v0, %v426_v35 }
  0xeb   : > { %v428_v38 = vpop.f32.mrf.mxu0 }
  0xec   : > { %v644_v39 = vmin.f32 %v426_v35, %v428_v38  ;;  %v571_v40 = vpop.f32.mrf.mxu1  ;;  %739 = vmin.xlane.f32.xlu1 %v656_v37  ;;  %v687_v11 = vmin.f32 %v684_v5, %v428_v38 }
  0xed   : > { %v432_v41 = vpop.f32.mrf.mxu0  ;;  %v691_v9 = vmin.f32 %v688_v3, %v571_v40 }
  0xee   : > { %v1010_v42 = vpop.f32.mrf.mxu1  ;;  %v657_v43 = vmin.f32 %v644_v39, %v566_v34  ;;  %v689_v12 = vmin.f32 %v686_v6, %v432_v41 }
  0xef   : > { %v434_v44 = vpop.f32.mrf.mxu0 }
  0xf0   : > { %v645_v45 = vmin.f32 %v432_v41, %v434_v44  ;;  %v576_v46 = vpop.f32.mrf.mxu1  ;;  %741 = vmin.xlane.f32.xlu1 %v657_v43  ;;  %v690_v17 = vmin.f32 %v687_v11, %v434_v44 }
  0xf1   : > { %v438_v47 = vpop.f32.mrf.mxu0  ;;  %v694_v15 = vmin.f32 %v691_v9, %v576_v46 }
  0xf2   : > { %v1013_v48 = vpop.f32.mrf.mxu1  ;;  %v658_v49 = vmin.f32 %v645_v45, %v571_v40  ;;  %v692_v18 = vmin.f32 %v689_v12, %v438_v47 }
  0xf3   : > { %v440_v50 = vpop.f32.mrf.mxu0 }
  0xf4   : > { %v646_v51 = vmin.f32 %v438_v47, %v440_v50  ;;  %v581_v52 = vpop.f32.mrf.mxu1  ;;  %743 = vmin.xlane.f32.xlu0 %v658_v49  ;;  %v693_v23 = vmin.f32 %v690_v17, %v440_v50 }
  0xf5   : > { %v444_v54 = vpop.f32.mrf.mxu0  ;;  %v697_v21 = vmin.f32 %v694_v15, %v581_v52 }
  0xf6   : > { %v1016_v55 = vpop.f32.mrf.mxu1  ;;  %v659_v56 = vmin.f32 %v646_v51, %v576_v46  ;;  %v695_v24 = vmin.f32 %v692_v18, %v444_v54 }
  0xf7   : > { %v446_v57 = vpop.f32.mrf.mxu0 }
  0xf8   : > { %v647_v59 = vmin.f32 %v444_v54, %v446_v57  ;;  %v586_v60 = vpop.f32.mrf.mxu1  ;;  %745 = vmin.xlane.f32.xlu1 %v659_v56  ;;  %v696_v29 = vmin.f32 %v693_v23, %v446_v57 }
  0xf9   : > { %v450_v62 = vpop.f32.mrf.mxu0  ;;  %v700_v27 = vmin.f32 %v697_v21, %v586_v60 }
  0xfa   : > { %v1019_v1 = vpop.f32.mrf.mxu1  ;;  %v660_v2 = vmin.f32 %v647_v59, %v581_v52  ;;  %v698_v30 = vmin.f32 %v695_v24, %v450_v62 }
  0xfb   : > { %v452_v4 = vpop.f32.mrf.mxu0 }
  0xfc   : > { %v648_v7 = vmin.f32 %v450_v62, %v452_v4  ;;  %v591_v8 = vpop.f32.mrf.mxu1  ;;  %747 = vmin.xlane.f32.xlu0 %v660_v2  ;;  %v699_v35 = vmin.f32 %v696_v29, %v452_v4 }
  0xfd   : > { %v456_v10 = vpop.f32.mrf.mxu0  ;;  %v703_v33 = vmin.f32 %v700_v27, %v591_v8 }
  0xfe   : > { %v1022_v13 = vpop.f32.mrf.mxu1  ;;  %v661_v14 = vmin.f32 %v648_v7, %v586_v60  ;;  %v701_v36 = vmin.f32 %v698_v30, %v456_v10 }
  0xff   : > { %v458_v16 = vpop.f32.mrf.mxu0 }
 0x100   : > { %v649_v19 = vmin.f32 %v456_v10, %v458_v16  ;;  %v596_v20 = vpop.f32.mrf.mxu1  ;;  %749 = vmin.xlane.f32.xlu1 %v661_v14  ;;  %v702_v41 = vmin.f32 %v699_v35, %v458_v16 }
 0x101   : > { %v462_v22 = vpop.f32.mrf.mxu0  ;;  %v706_v39 = vmin.f32 %v703_v33, %v596_v20 }
 0x102   : > { %v1025_v25 = vpop.f32.mrf.mxu1  ;;  %v662_v26 = vmin.f32 %v649_v19, %v591_v8  ;;  %v704_v42 = vmin.f32 %v701_v36, %v462_v22 }
 0x103   : > { %v464_v28 = vpop.f32.mrf.mxu0 }
 0x104   : > { %v650_v31 = vmin.f32 %v462_v22, %v464_v28  ;;  %v601_v32 = vpop.f32.mrf.mxu1  ;;  %751 = vmin.xlane.f32.xlu0 %v662_v26  ;;  %v705_v47 = vmin.f32 %v702_v41, %v464_v28 }
 0x105   : > { %v468_v34 = vpop.f32.mrf.mxu0  ;;  %v709_v45 = vmin.f32 %v706_v39, %v601_v32 }
 0x106   : > { %v1028_v37 = vpop.f32.mrf.mxu1  ;;  %v663_v38 = vmin.f32 %v650_v31, %v596_v20  ;;  %v707_v48 = vmin.f32 %v704_v42, %v468_v34 }
 0x107   : > { %v470_v40 = vpop.f32.mrf.mxu0 }
 0x108   : > { %v651_v43 = vmin.f32 %v468_v34, %v470_v40  ;;  %v606_v44 = vpop.f32.mrf.mxu1  ;;  %753 = vmin.xlane.f32.xlu1 %v663_v38  ;;  %v708_v53 = vmin.f32 %v705_v47, %v470_v40 }
 0x109   : > { %v474_v46 = vpop.f32.mrf.mxu0  ;;  %v712_v51 = vmin.f32 %v709_v45, %v606_v44 }
 0x10a   : > { %v1031_v49 = vpop.f32.mrf.mxu1  ;;  %v664_v50 = vmin.f32 %v651_v43, %v601_v32  ;;  %v710_v54 = vmin.f32 %v707_v48, %v474_v46 }
 0x10b   : > { %v476_v52 = vpop.f32.mrf.mxu0 }
 0x10c   : > { %v652_v55 = vmin.f32 %v474_v46, %v476_v52  ;;  %v611_v56 = vpop.f32.mrf.mxu1  ;;  %755 = vmin.xlane.f32.xlu0 %v664_v50  ;;  %v711_v59 = vmin.f32 %v708_v53, %v476_v52 }
 0x10d   : > { %v715_v57 = vmin.f32 %v712_v51, %v611_v56  ;;  %v480_v58 = vpop.f32.mrf.mxu0 }
 0x10e   : > { %v713_v60 = vmin.f32 %v710_v54, %v480_v58  ;;  %v665_v61 = vmin.f32 %v652_v55, %v606_v44  ;;  %v1034_v62 = vpop.f32.mrf.mxu1 }
 0x10f   : > { %718 = vst [vmem:[%s237_s10 + $0x10] sm:$0xff] %v715_v57  ;;  %v482_v63 = vpop.f32.mrf.mxu0 }
 0x110   : > { %716 = vst [vmem:[%s237_s10] sm:$0xff] %v713_v60  ;;  %v653_v0 = vmin.f32 %v480_v58, %v482_v63  ;;  %v714_v1 = vmin.f32 %v711_v59, %v482_v63  ;;  %757 = vmin.xlane.f32.xlu1 %v665_v61 }
 0x112   : > { %717 = vst [vmem:[%s237_s10 + $0x8] sm:$0xff] %v714_v1  ;;  %v666_v2 = vmin.f32 %v653_v0, %v611_v56 }
 0x114   : > { %759 = vmin.xlane.f32.xlu0 %v666_v2 }
 0x115   : > { %1109 = shalt.err (!%p1106_p5)
}
 0x116   : > { %s1110_s15 = scalar_lea.hbm %s805_s23, 384  ;;  %s1114_s8 = scalar_lea.hbm %s1411_s3, 768 }
 0x117   : > { %p1111_p6 = scmp.ne.s32.totalorder %s805_s23, %s1110_s15  ;;  %p1115_p10 = scmp.lt.s32.totalorder %s805_s23, %s1411_s3 }
 0x118   : > { %p1116_p11 = scmp.lt.s32.totalorder %s1114_s8, %s1110_s15 }
 0x119   : > { %p1112_p7 = pnand %p1111_p6, %p1237_p4 }
 0x11a   : > { %p1117_p12 = por %p1116_p11, %p1115_p10 }
 0x11b   : > { %p1113_p9 = pneg %p1112_p7 }
 0x11d   : > { %p1118_p13 = pnand %p1117_p12, %p1113_p9 }
 0x11f   : > { %1121 = shalt.err (!%p1118_p13)
}
 0x120   : > { %1039 = dma.vmem_to_hbm [thread:$0]  (%p1237_p4), %s808_s18, 384, %s805_s23, %s785_s28   ;;  %vm761_vm2 = vcmask 7168  }
 0x121   : > { %s266_s21 = scalar_lea.vmem %s1410_s2, %s1036_s27 }
 0x16d   : > { %v736_v3 = vpop.xlane.xlu0 %735 }
 0x16e   : > { %762 = vst.msk [vmem:[%s266_s21] sm:$0xff] %vm761_vm2, %v736_v3 }
 0x171   : > { %v738_v4 = vpop.xlane.xlu0 %737 }
 0x172   : > { %763 = vst.msk [vmem:[%s266_s21 + $0x8] sm:$0xff] %vm761_vm2, %v738_v4 }
 0x175   : > { %v740_v5 = vpop.xlane.xlu1 %739 }
 0x176   : > { %764 = vst.msk [vmem:[%s266_s21 + $0x10] sm:$0xff] %vm761_vm2, %v740_v5 }
 0x179   : > { %v742_v6 = vpop.xlane.xlu1 %741 }
 0x17a   : > { %765 = vst.msk [vmem:[%s266_s21 + $0x18] sm:$0xff] %vm761_vm2, %v742_v6 }
 0x17d   : > { %v744_v7 = vpop.xlane.xlu0 %743 }
 0x17e   : > { %766 = vst.msk [vmem:[%s266_s21 + $0x20] sm:$0xff] %vm761_vm2, %v744_v7 }
 0x181   : > { %v746_v8 = vpop.xlane.xlu1 %745 }
 0x182   : > { %767 = vst.msk [vmem:[%s266_s21 + $0x28] sm:$0xff] %vm761_vm2, %v746_v8 }
 0x185   : > { %v748_v9 = vpop.xlane.xlu0 %747 }
 0x186   : > { %768 = vst.msk [vmem:[%s266_s21 + $0x30] sm:$0xff] %vm761_vm2, %v748_v9 }
 0x189   : > { %v750_v10 = vpop.xlane.xlu1 %749 }
 0x18a   : > { %769 = vst.msk [vmem:[%s266_s21 + $0x38] sm:$0xff] %vm761_vm2, %v750_v10 }
 0x18d   : > { %v752_v11 = vpop.xlane.xlu0 %751 }
 0x18e   : > { %770 = vst.msk [vmem:[%s266_s21 + $0x40] sm:$0xff] %vm761_vm2, %v752_v11 }
 0x191   : > { %v754_v12 = vpop.xlane.xlu1 %753 }
 0x192   : > { %771 = vst.msk [vmem:[%s266_s21 + $0x48] sm:$0xff] %vm761_vm2, %v754_v12 }
 0x195   : > { %v756_v13 = vpop.xlane.xlu0 %755 }
 0x196   : > { %772 = vst.msk [vmem:[%s266_s21 + $0x50] sm:$0xff] %vm761_vm2, %v756_v13 }
 0x199   : > { %v758_v14 = vpop.xlane.xlu1 %757 }
 0x19a   : > { %773 = vst.msk [vmem:[%s266_s21 + $0x58] sm:$0xff] %vm761_vm2, %v758_v14 }
 0x19d   : > { %v760_v15 = vpop.xlane.xlu0 %759 }
 0x19e   : > { %774 = vst.msk [vmem:[%s266_s21 + $0x60] sm:$0xff] %vm761_vm2, %v760_v15 }
 0x19f PF: > { %p1045_p4 = scmp.ge.s32.totalorder %s1172_s17, 2  ;;  %s831_s22 = sand.u32 1, %s1152_s12  }
 0x1a0   : > { %s832_s26 = scalar_lea.sflag [#allocation4], %s831_s22 }
 0x1a1   : > { %p1042_p0 = pnand %p1045_p4, %p1244_p8 }
 0x1a3   : > { %p1043_p1 = pneg %p1042_p0 }
 0x1a5   : > { %1147 = dma.done.wait (%p1043_p1), %s832_s26, 384  }
 0x1a6   : > { %1149 = vsyncadd (%p1043_p1), %s832_s26, 4294966912  ;;  %s17_s17 = sadd.s32 1, %s1172_s17   ;;  %s1414_s12 = smov %s1156_s13 }
 0x1a7   : > { %p14_p2 = scmp.ge.s32.totalorder %s17_s17, 4   ;;  %s1415_s13 = smov %s1160_s14 }
 0x1a8   : > { %s1416_s14 = smov %s1250_s25  ;;  %s1417_s15 = smov %s1168_s16 }
 0x1a9   : > { %s1418_s16 = smov %s1420_s20  ;;  %16 = sbr.rel (!%p14_p2) target bundleno = 4 (0x4), region = 86 }
 0x1ae   :  { %837 = vsyncpa [#allocation4], 1 }
 0x1af   :  { %839 = vsyncpa [#allocation4 + $0x1], 1 }

</bundles_post_ra>
